<compile_context>
chip_gen: v7x
topology: tpu7x:2x2x1
jax: 0.10.0
libtpu: 0.0.40
codegen_flags: <defaults>
</compile_context>

<pallas_src>
import functools

import jax
import jax.numpy as jnp
from jax.experimental import pallas as pl
from jax.experimental.pallas import tpu as pltpu

# ---------------- model dimensions (small, synthetic) ----------------
HIDDEN = 128          # config.hidden_size
INTERMEDIATE = 256    # dense MLP intermediate size
NUM_HEADS = 4
HEAD_DIM = HIDDEN // NUM_HEADS
VOCAB = 512
SEQ = 8               # number of tokens (vLLM-style flat token dim)
EPS = 1e-6            # config.rms_norm_eps

_BF16 = jnp.bfloat16
_F32 = jnp.float32


# ---------------- shared in-kernel helpers ----------------
def _rms(x, w, eps):
    # f32 RMSNorm; w is a (H,) lane vector broadcast over rows.
    inv = jax.lax.rsqrt(jnp.mean(x * x, axis=-1, keepdims=True) + eps)
    return x * inv * w


def _mm(x, w):
    # Weights are pre-transposed to [K, N]: plain x @ W, bf16 operands,
    # f32 accumulation (no in-kernel weight transpose).
    return jnp.dot(x.astype(_BF16), w, preferred_element_type=jnp.float32)


def _decoder_core(tok_ref, prev_ref, cs_ref, norms_ref,
                  w_eh_tok_ref, w_eh_prev_ref, w_qkvr_ref, w_o_ref,
                  w_gate_up_ref, w_down_ref,
                  *, eps, num_heads, head_dim, intermediate):
    """Full decoder path; returns final-normed hidden states (T, H) f32."""
    hidden = num_heads * head_dim

    # Packed (8, H) f32 norm weights: rows = enorm, hnorm, input_layernorm,
    # post_attention_layernorm, shared_head.norm (rest padding).
    norms = norms_ref[...]
    enorm_w, hnorm_w = norms[0], norms[1]
    ln_in_w, ln_post_w, ln_final_w = norms[2], norms[3], norms[4]

    cos = cs_ref[0].astype(_F32)          # (T, H)
    sin = cs_ref[1].astype(_F32)

    # --- enorm(embed) / hnorm(previous_hidden_states) ---
    tok = _rms(tok_ref[...].astype(_F32), enorm_w, eps)
    prev = _rms(prev_ref[...].astype(_F32), hnorm_w, eps)

    # --- eh_proj(cat([tok, prev], -1)) == tok @ W_tok + prev @ W_prev ---
    residual = _mm(tok, w_eh_tok_ref[...]) + _mm(prev, w_eh_prev_ref[...])  # (T, H)

    # ---- DeepseekDecoderLayer ----
    # TODO(synk): MLA latent attention (partial RoPE), MoE routed experts and
    # KV-cache handling are replaced with dense MHA + dense SiLU MLP (prefill).
    h = _rms(residual, ln_in_w, eps)

    # Fused QKV(+rotate-half) matmul: (T,128) x (128,640) ->
    # [q | rot(q) | k | rot(k) | v]; RoPE permutation and 1/sqrt(head_dim)
    # scale are folded into the weight columns at setup, so RoPE is just FMAs
    # on lane-aligned 128-wide slices (no XLU lane shuffles).
    qkvr = _mm(h, w_qkvr_ref[...])                                   # (T, 5H)
    q = qkvr[:, 0 * hidden:1 * hidden] * cos + qkvr[:, 1 * hidden:2 * hidden] * sin
    k = qkvr[:, 2 * hidden:3 * hidden] * cos + qkvr[:, 3 * hidden:4 * hidden] * sin
    v = qkvr[:, 4 * hidden:5 * hidden]

    # Cast once as full-width arrays (not per 32-lane head slice).
    qb, kb, vb = q.astype(_BF16), k.astype(_BF16), v.astype(_BF16)

    t = qb.shape[0]
    row = jax.lax.broadcasted_iota(jnp.int32, (t, t), 0)
    col = jax.lax.broadcasted_iota(jnp.int32, (t, t), 1)
    causal = col <= row
    neg = jnp.float32(-1e30)   # finite mask value: robust even to empty rows

    # Causal MHA, all heads statically unrolled.  Each head's output is folded
    # through its o_proj row-slice and accumulated in f32 -> no lane concat of
    # head outputs, no separate (T,H)@(H,H) o_proj matmul.
    attn_out = jnp.zeros((t, hidden), jnp.float32)
    for hh in range(num_heads):
        sl = slice(hh * head_dim, (hh + 1) * head_dim)
        # q @ k.T via dot_general contraction on dim 1 (no explicit transpose).
        s = jax.lax.dot_general(qb[:, sl], kb[:, sl],
                                dimension_numbers=(((1,), (1,)), ((), ())),
                                preferred_element_type=jnp.float32)
        s = jnp.where(causal, s, neg)
        s = s - jnp.max(s, axis=-1, keepdims=True)
        p = jnp.exp(s)
        p = p * pl.reciprocal(jnp.sum(p, axis=-1, keepdims=True), approx=True)
        o_h = jnp.dot(p.astype(_BF16), vb[:, sl],
                      preferred_element_type=jnp.float32)            # (T, hd)
        attn_out = attn_out + jnp.dot(o_h.astype(_BF16), w_o_ref[sl, :],
                                      preferred_element_type=jnp.float32)

    # fused residual add + RMSNorm (post_attention_layernorm)
    s2 = attn_out + residual
    h2 = _rms(s2, ln_post_w, eps)

    # fused gate/up projection + SiLU gate
    gu = _mm(h2, w_gate_up_ref[...])                                 # (T, 2I)
    g = gu[:, :intermediate]
    u = gu[:, intermediate:]
    act = g * jax.nn.sigmoid(g) * u
    mlp_out = _mm(act, w_down_ref[...])                              # (T, H)

    # shared_head['norm'](encoded_states, residual): fused add + RMSNorm
    s3 = mlp_out + s2
    return _rms(s3, ln_final_w, eps)                                 # (T, H) f32


# ---------------- kernels ----------------
def _mtp_logits_kernel(tok_ref, prev_ref, cs_ref, norms_ref,
                       w_eh_tok_ref, w_eh_prev_ref, w_qkvr_ref, w_o_ref,
                       w_gate_up_ref, w_down_ref, w_lm_hbm_ref,
                       logits_ref, w_lm_vmem, dma_sem,
                       *, eps, num_heads, head_dim, intermediate):
    # Start the lm_head weight transfer immediately; it overlaps the whole
    # serial decoder chain (w_lm is the largest input, in ANY/HBM space).
    cp = pltpu.make_async_copy(w_lm_hbm_ref, w_lm_vmem, dma_sem)
    cp.start()

    hf = _decoder_core(tok_ref, prev_ref, cs_ref, norms_ref,
                       w_eh_tok_ref, w_eh_prev_ref, w_qkvr_ref, w_o_ref,
                       w_gate_up_ref, w_down_ref,
                       eps=eps, num_heads=num_heads, head_dim=head_dim,
                       intermediate=intermediate)

    cp.wait()
    # lm_head (tensor_model_parallel_all_gather is identity for tp_size == 1)
    logits_ref[...] = _mm(hf, w_lm_vmem[...]).astype(logits_ref.dtype)


def _mtp_hidden_kernel(tok_ref, prev_ref, cs_ref, norms_ref,
                       w_eh_tok_ref, w_eh_prev_ref, w_qkvr_ref, w_o_ref,
                       w_gate_up_ref, w_down_ref, hidden_ref,
                       *, eps, num_heads, head_dim, intermediate):
    hidden_ref[...] = _decoder_core(
        tok_ref, prev_ref, cs_ref, norms_ref,
        w_eh_tok_ref, w_eh_prev_ref, w_qkvr_ref, w_o_ref,
        w_gate_up_ref, w_down_ref,
        eps=eps, num_heads=num_heads, head_dim=head_dim,
        intermediate=intermediate).astype(hidden_ref.dtype)


def _lm_head_kernel(h_ref, w_lm_ref, logits_ref):
    logits_ref[...] = _mm(h_ref[...], w_lm_ref[...]).astype(logits_ref.dtype)


# ---------------- parameter setup / plain-JAX glue ----------------
def init_params(key):
    def w(key, shape, scale=0.02):
        return scale * jax.random.normal(key, shape, dtype=jnp.float32)

    ks = jax.random.split(key, 16)
    return {
        # ignore_share_weight=True in the module, so embedding + lm head are
        # synthesized deterministically here.
        "embed_tokens": w(ks[0], (VOCAB, HIDDEN)),
        "enorm": jnp.ones((HIDDEN,), jnp.float32),
        "hnorm": jnp.ones((HIDDEN,), jnp.float32),
        "eh_proj": w(ks[1], (HIDDEN, 2 * HIDDEN)),
        "input_layernorm": jnp.ones((HIDDEN,), jnp.float32),
        "q_proj": w(ks[2], (NUM_HEADS * HEAD_DIM, HIDDEN)),
        "k_proj": w(ks[3], (NUM_HEADS * HEAD_DIM, HIDDEN)),
        "v_proj": w(ks[4], (NUM_HEADS * HEAD_DIM, HIDDEN)),
        "o_proj": w(ks[5], (HIDDEN, NUM_HEADS * HEAD_DIM)),
        "post_attention_layernorm": jnp.ones((HIDDEN,), jnp.float32),
        "gate_proj": w(ks[6], (INTERMEDIATE, HIDDEN)),
        "up_proj": w(ks[7], (INTERMEDIATE, HIDDEN)),
        "down_proj": w(ks[8], (HIDDEN, INTERMEDIATE)),
        "final_norm": jnp.ones((HIDDEN,), jnp.float32),
        "lm_head": w(ks[9], (VOCAB, HIDDEN)),
    }


def prepare_weights(params):
    """One-time setup: pre-transpose PyTorch [out, in] weights to [in, out],
    fuse QKV (+ rotate-half RoPE columns + attention scale), fuse gate/up,
    cast matmul weights to bf16, pack the five RMSNorm vectors into one
    (8, H) f32 tile."""
    bf = jnp.bfloat16
    half = HEAD_DIM // 2
    scale = 1.0 / (HEAD_DIM ** 0.5)

    def rot_cols(wt):
        # wt: (hidden_in, num_heads*head_dim), heads contiguous along out axis.
        # Build W_rot such that x @ W_rot == rotate_half(x @ wt) per head.
        r = wt.reshape(HIDDEN, NUM_HEADS, HEAD_DIM)
        a, b = r[..., :half], r[..., half:]
        return jnp.concatenate([-b, a], axis=-1).reshape(HIDDEN,
                                                         NUM_HEADS * HEAD_DIM)

    wt_q = params["q_proj"].T              # (H, H)
    wt_k = params["k_proj"].T
    wt_v = params["v_proj"].T
    w_qkvr = jnp.concatenate(
        [wt_q * scale, rot_cols(wt_q) * scale,      # q, rot(q)  (scale folded)
         wt_k, rot_cols(wt_k),                      # k, rot(k)
         wt_v], axis=1).astype(bf)                  # (H, 5H) = (128, 640)

    w_eh = params["eh_proj"]                        # (H, 2H)

    norms = jnp.stack([
        params["enorm"], params["hnorm"], params["input_layernorm"],
        params["post_attention_layernorm"], params["final_norm"],
        jnp.ones((HIDDEN,), jnp.float32),           # padding rows
        jnp.ones((HIDDEN,), jnp.float32),
        jnp.ones((HIDDEN,), jnp.float32),
    ]).astype(jnp.float32)                          # (8, H) — one sublane tile

    return {
        "embed_tokens": params["embed_tokens"],
        "norms": norms,
        "w_eh_tok": w_eh[:, :HIDDEN].T.astype(bf),          # (H, H)
        "w_eh_prev": w_eh[:, HIDDEN:].T.astype(bf),          # (H, H)
        "w_qkvr": w_qkvr,                                    # (H, 5H)
        "w_o": params["o_proj"].T.astype(bf),                # (H, H)
        "w_gate_up": jnp.concatenate(
            [params["gate_proj"], params["up_proj"]], axis=0).T.astype(bf),  # (H, 2I)
        "w_down": params["down_proj"].T.astype(bf),          # (I, H)
        "w_lm": params["lm_head"].T.astype(bf),              # (H, VOCAB)
    }


def rope_tables(positions, num_heads=NUM_HEADS, head_dim=HEAD_DIM):
    """Per-lane cos/sin tables packed as (2, T, H) (rotate-half layout)."""
    half = head_dim // 2
    inv_freq = 1.0 / (10000.0 ** (jnp.arange(0, half, dtype=jnp.float32) / half))
    freqs = positions[:, None].astype(jnp.float32) * inv_freq[None, :]   # (T, half)
    cos = jnp.cos(freqs)
    sin = jnp.sin(freqs)
    cos_full = jnp.tile(jnp.concatenate([cos, cos], axis=-1), (1, num_heads))
    sin_full = jnp.tile(jnp.concatenate([sin, sin], axis=-1), (1, num_heads))
    return jnp.stack([cos_full, sin_full])                   # (2, T, H)


def deepseek_v3_mtp_forward(weights, input_ids, positions,
                            previous_hidden_states, selected_indices=None,
                            logits_dtype=jnp.float32):
    """Mirrors DeepseekV3MTP.forward (tp_size == 1, dp_size <= 1)."""
    # Embedding gather + RoPE phase tables are tiny plain-JAX glue; everything
    # else runs in Pallas.
    tok_embeds = weights["embed_tokens"][input_ids]          # (T, H)
    cs = rope_tables(positions)                              # (2, T, H)
    t = tok_embeds.shape[0]

    kern_kwargs = dict(eps=EPS, num_heads=NUM_HEADS, head_dim=HEAD_DIM,
                       intermediate=INTERMEDIATE)
    decoder_inputs = (tok_embeds, previous_hidden_states, cs, weights["norms"],
                      weights["w_eh_tok"], weights["w_eh_prev"],
                      weights["w_qkvr"], weights["w_o"],
                      weights["w_gate_up"], weights["w_down"])

    if selected_indices is None:
        vmem = pl.BlockSpec(memory_space=pltpu.MemorySpace.VMEM)
        return pl.pallas_call(
            functools.partial(_mtp_logits_kernel, **kern_kwargs),
            out_shape=jax.ShapeDtypeStruct((t, VOCAB), logits_dtype),
            in_specs=[vmem] * len(decoder_inputs)
                     + [pl.BlockSpec(memory_space=pl.ANY)],   # w_lm: manual DMA
            out_specs=vmem,
            scratch_shapes=[pltpu.VMEM((HIDDEN, VOCAB), jnp.bfloat16),
                            pltpu.SemaphoreType.DMA],
        )(*decoder_inputs, weights["w_lm"])

    # selected_indices path: gather hidden states BEFORE lm_head so only the
    # selected rows pay the vocab projection + logits writeback (lm_head is
    # linear per-row, so this is mathematically identical to gathering logits).
    hidden = pl.pallas_call(
        functools.partial(_mtp_hidden_kernel, **kern_kwargs),
        out_shape=jax.ShapeDtypeStruct((t, HIDDEN), jnp.float32),
    )(*decoder_inputs)
    h_sel = hidden[selected_indices]
    return pl.pallas_call(
        _lm_head_kernel,
        out_shape=jax.ShapeDtypeStruct((h_sel.shape[0], VOCAB), logits_dtype),
    )(h_sel, weights["w_lm"])


if __name__ == "__main__":
    key = jax.random.PRNGKey(0)
    kp, ki, kh = jax.random.split(key, 3)
    params = init_params(kp)
    weights = prepare_weights(params)

    input_ids = jax.random.randint(ki, (SEQ,), 0, VOCAB, dtype=jnp.int32)
    positions = jnp.arange(SEQ, dtype=jnp.int32)
    previous_hidden_states = jax.random.normal(kh, (SEQ, HIDDEN), dtype=jnp.float32)

    fwd = jax.jit(deepseek_v3_mtp_forward)

    # Path 1: full logits (attn_metadata-style prefill, no selection).
    logits = jax.block_until_ready(
        fwd(weights, input_ids, positions, previous_hidden_states))
    assert logits.shape == (SEQ, VOCAB), logits.shape
    assert bool(jnp.all(jnp.isfinite(logits)))

    # Path 2: selected_indices — gather hidden states before lm_head.
    sel = jnp.array([3, SEQ - 1], dtype=jnp.int32)
    logits_sel = jax.block_until_ready(
        fwd(weights, input_ids, positions, previous_hidden_states, sel))
    assert logits_sel.shape == (2, VOCAB), logits_sel.shape
    assert bool(jnp.all(jnp.isfinite(logits_sel)))

    print("KERNEL_OK")
</pallas_src>

<mosaic_0001>
module attributes {stable_mosaic.version = 11 : i64} {
  func.func @_mtp_logits_kernel(%arg0: memref<8x128xf32, #tpu.memory_space<vmem>>, %arg1: memref<8x128xf32, #tpu.memory_space<vmem>>, %arg2: memref<2x8x128xf32, #tpu.memory_space<vmem>>, %arg3: memref<8x128xf32, #tpu.memory_space<vmem>>, %arg4: memref<128x128xbf16, #tpu.memory_space<vmem>>, %arg5: memref<128x128xbf16, #tpu.memory_space<vmem>>, %arg6: memref<128x640xbf16, #tpu.memory_space<vmem>>, %arg7: memref<128x128xbf16, #tpu.memory_space<vmem>>, %arg8: memref<128x512xbf16, #tpu.memory_space<vmem>>, %arg9: memref<256x128xbf16, #tpu.memory_space<vmem>>, %arg10: memref<128x512xbf16, #tpu.memory_space<any>>, %arg11: memref<8x512xf32, #tpu.memory_space<vmem>>, %arg12: memref<128x512xbf16, #tpu.memory_space<vmem>>, %arg13: memref<!tpu.dma_semaphore, #tpu.memory_space<semaphore_mem>>) attributes {dimension_semantics = [], scalar_prefetch = 0 : i64, scratch_operands = 2 : i64, tpu.core_type = #tpu.core_type<tc>} {
    tpu.enqueue_dma source(%arg10 : memref<128x512xbf16, #tpu.memory_space<any>>) target(%arg12 : memref<128x512xbf16, #tpu.memory_space<vmem>>) target_semaphore(%arg13 : memref<!tpu.dma_semaphore, #tpu.memory_space<semaphore_mem>>)
    %c0 = arith.constant 0 : index
    %c0_0 = arith.constant 0 : index
    %0 = vector.load %arg3[%c0, %c0_0] : memref<8x128xf32, #tpu.memory_space<vmem>>, vector<8x128xf32>
    %1 = vector.extract_strided_slice %0 {offsets = [0, 0], sizes = [1, 128], strides = [1, 1]} : vector<8x128xf32> to vector<1x128xf32>
    %2 = vector.shape_cast %1 : vector<1x128xf32> to vector<128xf32>
    %3 = vector.extract_strided_slice %0 {offsets = [1, 0], sizes = [1, 128], strides = [1, 1]} : vector<8x128xf32> to vector<1x128xf32>
    %4 = vector.shape_cast %3 : vector<1x128xf32> to vector<128xf32>
    %5 = vector.extract_strided_slice %0 {offsets = [2, 0], sizes = [1, 128], strides = [1, 1]} : vector<8x128xf32> to vector<1x128xf32>
    %6 = vector.shape_cast %5 : vector<1x128xf32> to vector<128xf32>
    %7 = vector.extract_strided_slice %0 {offsets = [3, 0], sizes = [1, 128], strides = [1, 1]} : vector<8x128xf32> to vector<1x128xf32>
    %8 = vector.shape_cast %7 : vector<1x128xf32> to vector<128xf32>
    %9 = vector.extract_strided_slice %0 {offsets = [4, 0], sizes = [1, 128], strides = [1, 1]} : vector<8x128xf32> to vector<1x128xf32>
    %10 = vector.shape_cast %9 : vector<1x128xf32> to vector<128xf32>
    %c0_1 = arith.constant 0 : index
    %c0_2 = arith.constant 0 : index
    %c0_3 = arith.constant 0 : index
    %11 = vector.load %arg2[%c0_1, %c0_2, %c0_3] : memref<2x8x128xf32, #tpu.memory_space<vmem>>, vector<1x8x128xf32>
    %12 = vector.shape_cast %11 : vector<1x8x128xf32> to vector<8x128xf32>
    %c1 = arith.constant 1 : index
    %c0_4 = arith.constant 0 : index
    %c0_5 = arith.constant 0 : index
    %13 = vector.load %arg2[%c1, %c0_4, %c0_5] : memref<2x8x128xf32, #tpu.memory_space<vmem>>, vector<1x8x128xf32>
    %14 = vector.shape_cast %13 : vector<1x8x128xf32> to vector<8x128xf32>
    %c0_6 = arith.constant 0 : index
    %c0_7 = arith.constant 0 : index
    %15 = vector.load %arg0[%c0_6, %c0_7] : memref<8x128xf32, #tpu.memory_space<vmem>>, vector<8x128xf32>
    %16 = arith.mulf %15, %15 : vector<8x128xf32>
    %cst = arith.constant dense<0.000000e+00> : vector<8xf32>
    %17 = vector.multi_reduction <add>, %16, %cst [1] : vector<8x128xf32> to vector<8xf32>
    %18 = vector.shape_cast %17 : vector<8xf32> to vector<8x1xf32>
    %cst_8 = arith.constant 1.280000e+02 : f32
    %19 = vector.broadcast %cst_8 : f32 to vector<8x1xf32>
    %20 = arith.divf %18, %19 : vector<8x1xf32>
    %cst_9 = arith.constant 9.99999997E-7 : f32
    %21 = vector.broadcast %cst_9 : f32 to vector<8x1xf32>
    %22 = arith.addf %20, %21 : vector<8x1xf32>
    %23 = math.rsqrt %22 : vector<8x1xf32>
    %24 = vector.broadcast %23 : vector<8x1xf32> to vector<8x128xf32>
    %25 = arith.mulf %15, %24 : vector<8x128xf32>
    %26 = vector.shape_cast %2 : vector<128xf32> to vector<1x128xf32>
    %27 = vector.broadcast %26 : vector<1x128xf32> to vector<8x128xf32>
    %28 = arith.mulf %25, %27 : vector<8x128xf32>
    %c0_10 = arith.constant 0 : index
    %c0_11 = arith.constant 0 : index
    %29 = vector.load %arg1[%c0_10, %c0_11] : memref<8x128xf32, #tpu.memory_space<vmem>>, vector<8x128xf32>
    %30 = arith.mulf %29, %29 : vector<8x128xf32>
    %cst_12 = arith.constant dense<0.000000e+00> : vector<8xf32>
    %31 = vector.multi_reduction <add>, %30, %cst_12 [1] : vector<8x128xf32> to vector<8xf32>
    %32 = vector.shape_cast %31 : vector<8xf32> to vector<8x1xf32>
    %cst_13 = arith.constant 1.280000e+02 : f32
    %33 = vector.broadcast %cst_13 : f32 to vector<8x1xf32>
    %34 = arith.divf %32, %33 : vector<8x1xf32>
    %cst_14 = arith.constant 9.99999997E-7 : f32
    %35 = vector.broadcast %cst_14 : f32 to vector<8x1xf32>
    %36 = arith.addf %34, %35 : vector<8x1xf32>
    %37 = math.rsqrt %36 : vector<8x1xf32>
    %38 = vector.broadcast %37 : vector<8x1xf32> to vector<8x128xf32>
    %39 = arith.mulf %29, %38 : vector<8x128xf32>
    %40 = vector.shape_cast %4 : vector<128xf32> to vector<1x128xf32>
    %41 = vector.broadcast %40 : vector<1x128xf32> to vector<8x128xf32>
    %42 = arith.mulf %39, %41 : vector<8x128xf32>
    %c0_15 = arith.constant 0 : index
    %c0_16 = arith.constant 0 : index
    %43 = vector.load %arg4[%c0_15, %c0_16] : memref<128x128xbf16, #tpu.memory_space<vmem>>, vector<128x128xbf16>
    %44 = arith.truncf %28 : vector<8x128xf32> to vector<8x128xbf16>
    %cst_17 = arith.constant dense<0.000000e+00> : vector<8x128xf32>
    %45 = tpu.matmul %44, %43, %cst_17 {dimension_numbers = #tpu.dot_dimension_numbers<[1], [0], [0], [1], [0, 0, 1, 1], [], []>} : vector<8x128xbf16>, vector<128x128xbf16>, vector<8x128xf32> -> vector<8x128xf32>
    %c0_18 = arith.constant 0 : index
    %c0_19 = arith.constant 0 : index
    %46 = vector.load %arg5[%c0_18, %c0_19] : memref<128x128xbf16, #tpu.memory_space<vmem>>, vector<128x128xbf16>
    %47 = arith.truncf %42 : vector<8x128xf32> to vector<8x128xbf16>
    %cst_20 = arith.constant dense<0.000000e+00> : vector<8x128xf32>
    %48 = tpu.matmul %47, %46, %cst_20 {dimension_numbers = #tpu.dot_dimension_numbers<[1], [0], [0], [1], [0, 0, 1, 1], [], []>} : vector<8x128xbf16>, vector<128x128xbf16>, vector<8x128xf32> -> vector<8x128xf32>
    %49 = arith.addf %45, %48 : vector<8x128xf32>
    %50 = arith.mulf %49, %49 : vector<8x128xf32>
    %cst_21 = arith.constant dense<0.000000e+00> : vector<8xf32>
    %51 = vector.multi_reduction <add>, %50, %cst_21 [1] : vector<8x128xf32> to vector<8xf32>
    %52 = vector.shape_cast %51 : vector<8xf32> to vector<8x1xf32>
    %cst_22 = arith.constant 1.280000e+02 : f32
    %53 = vector.broadcast %cst_22 : f32 to vector<8x1xf32>
    %54 = arith.divf %52, %53 : vector<8x1xf32>
    %cst_23 = arith.constant 9.99999997E-7 : f32
    %55 = vector.broadcast %cst_23 : f32 to vector<8x1xf32>
    %56 = arith.addf %54, %55 : vector<8x1xf32>
    %57 = math.rsqrt %56 : vector<8x1xf32>
    %58 = vector.broadcast %57 : vector<8x1xf32> to vector<8x128xf32>
    %59 = arith.mulf %49, %58 : vector<8x128xf32>
    %60 = vector.shape_cast %6 : vector<128xf32> to vector<1x128xf32>
    %61 = vector.broadcast %60 : vector<1x128xf32> to vector<8x128xf32>
    %62 = arith.mulf %59, %61 : vector<8x128xf32>
    %c0_24 = arith.constant 0 : index
    %c0_25 = arith.constant 0 : index
    %63 = vector.load %arg6[%c0_24, %c0_25] : memref<128x640xbf16, #tpu.memory_space<vmem>>, vector<128x640xbf16>
    %64 = arith.truncf %62 : vector<8x128xf32> to vector<8x128xbf16>
    %cst_26 = arith.constant dense<0.000000e+00> : vector<8x640xf32>
    %65 = tpu.matmul %64, %63, %cst_26 {dimension_numbers = #tpu.dot_dimension_numbers<[1], [0], [0], [1], [0, 0, 1, 1], [], []>} : vector<8x128xbf16>, vector<128x640xbf16>, vector<8x640xf32> -> vector<8x640xf32>
    %66 = vector.extract_strided_slice %65 {offsets = [0, 0], sizes = [8, 128], strides = [1, 1]} : vector<8x640xf32> to vector<8x128xf32>
    %67 = arith.mulf %66, %12 : vector<8x128xf32>
    %68 = vector.extract_strided_slice %65 {offsets = [0, 128], sizes = [8, 128], strides = [1, 1]} : vector<8x640xf32> to vector<8x128xf32>
    %69 = arith.mulf %68, %14 : vector<8x128xf32>
    %70 = arith.addf %67, %69 : vector<8x128xf32>
    %71 = vector.extract_strided_slice %65 {offsets = [0, 256], sizes = [8, 128], strides = [1, 1]} : vector<8x640xf32> to vector<8x128xf32>
    %72 = arith.mulf %71, %12 : vector<8x128xf32>
    %73 = vector.extract_strided_slice %65 {offsets = [0, 384], sizes = [8, 128], strides = [1, 1]} : vector<8x640xf32> to vector<8x128xf32>
    %74 = arith.mulf %73, %14 : vector<8x128xf32>
    %75 = arith.addf %72, %74 : vector<8x128xf32>
    %76 = vector.extract_strided_slice %65 {offsets = [0, 512], sizes = [8, 128], strides = [1, 1]} : vector<8x640xf32> to vector<8x128xf32>
    %77 = arith.truncf %70 : vector<8x128xf32> to vector<8x128xbf16>
    %78 = arith.truncf %75 : vector<8x128xf32> to vector<8x128xbf16>
    %79 = arith.truncf %76 : vector<8x128xf32> to vector<8x128xbf16>
    %80 = tpu.iota {dimensions = array<i32: 0>} : vector<8x8xi32>
    %81 = tpu.iota {dimensions = array<i32: 1>} : vector<8x8xi32>
    %82 = arith.cmpi sle, %81, %80 : vector<8x8xi32>
    %cst_27 = arith.constant 0.000000e+00 : f32
    %83 = vector.broadcast %cst_27 : f32 to vector<8x128xf32>
    %84 = vector.extract_strided_slice %77 {offsets = [0, 0], sizes = [8, 32], strides = [1, 1]} : vector<8x128xbf16> to vector<8x32xbf16>
    %85 = vector.extract_strided_slice %78 {offsets = [0, 0], sizes = [8, 32], strides = [1, 1]} : vector<8x128xbf16> to vector<8x32xbf16>
    %cst_28 = arith.constant dense<0.000000e+00> : vector<8x8xf32>
    %86 = tpu.matmul %84, %85, %cst_28 {dimension_numbers = #tpu.dot_dimension_numbers<[1], [1], [0], [0], [0, 0, 1, 0], [], []>} : vector<8x32xbf16>, vector<8x32xbf16>, vector<8x8xf32> -> vector<8x8xf32>
    %cst_29 = arith.constant -1.000000e+30 : f32
    %87 = vector.broadcast %cst_29 : f32 to vector<8x8xf32>
    %88 = arith.select %82, %86, %87 : vector<8x8xi1>, vector<8x8xf32>
    %cst_30 = arith.constant dense<0xFF800000> : vector<8xf32>
    %89 = vector.multi_reduction <maximumf>, %88, %cst_30 [1] : vector<8x8xf32> to vector<8xf32>
    %90 = vector.shape_cast %89 : vector<8xf32> to vector<8x1xf32>
    %91 = vector.broadcast %90 : vector<8x1xf32> to vector<8x8xf32>
    %92 = arith.subf %88, %91 : vector<8x8xf32>
    %93 = math.exp %92 : vector<8x8xf32>
    %cst_31 = arith.constant dense<0.000000e+00> : vector<8xf32>
    %94 = vector.multi_reduction <add>, %93, %cst_31 [1] : vector<8x8xf32> to vector<8xf32>
    %95 = vector.shape_cast %94 : vector<8xf32> to vector<8x1xf32>
    %96 = tpu.reciprocal %95 {approx = true} : vector<8x1xf32> -> vector<8x1xf32>
    %97 = vector.broadcast %96 : vector<8x1xf32> to vector<8x8xf32>
    %98 = arith.mulf %93, %97 : vector<8x8xf32>
    %99 = arith.truncf %98 : vector<8x8xf32> to vector<8x8xbf16>
    %100 = vector.extract_strided_slice %79 {offsets = [0, 0], sizes = [8, 32], strides = [1, 1]} : vector<8x128xbf16> to vector<8x32xbf16>
    %cst_32 = arith.constant dense<0.000000e+00> : vector<8x32xf32>
    %101 = tpu.matmul %99, %100, %cst_32 {dimension_numbers = #tpu.dot_dimension_numbers<[1], [0], [0], [1], [0, 0, 1, 1], [], []>} : vector<8x8xbf16>, vector<8x32xbf16>, vector<8x32xf32> -> vector<8x32xf32>
    %102 = arith.truncf %101 : vector<8x32xf32> to vector<8x32xbf16>
    %c0_33 = arith.constant 0 : index
    %c0_34 = arith.constant 0 : index
    %103 = vector.load %arg7[%c0_33, %c0_34] : memref<128x128xbf16, #tpu.memory_space<vmem>>, vector<32x128xbf16>
    %cst_35 = arith.constant dense<0.000000e+00> : vector<8x128xf32>
    %104 = tpu.matmul %102, %103, %cst_35 {dimension_numbers = #tpu.dot_dimension_numbers<[1], [0], [0], [1], [0, 0, 1, 1], [], []>} : vector<8x32xbf16>, vector<32x128xbf16>, vector<8x128xf32> -> vector<8x128xf32>
    %105 = arith.addf %83, %104 : vector<8x128xf32>
    %106 = vector.extract_strided_slice %77 {offsets = [0, 32], sizes = [8, 32], strides = [1, 1]} : vector<8x128xbf16> to vector<8x32xbf16>
    %107 = vector.extract_strided_slice %78 {offsets = [0, 32], sizes = [8, 32], strides = [1, 1]} : vector<8x128xbf16> to vector<8x32xbf16>
    %cst_36 = arith.constant dense<0.000000e+00> : vector<8x8xf32>
    %108 = tpu.matmul %106, %107, %cst_36 {dimension_numbers = #tpu.dot_dimension_numbers<[1], [1], [0], [0], [0, 0, 1, 0], [], []>} : vector<8x32xbf16>, vector<8x32xbf16>, vector<8x8xf32> -> vector<8x8xf32>
    %cst_37 = arith.constant -1.000000e+30 : f32
    %109 = vector.broadcast %cst_37 : f32 to vector<8x8xf32>
    %110 = arith.select %82, %108, %109 : vector<8x8xi1>, vector<8x8xf32>
    %cst_38 = arith.constant dense<0xFF800000> : vector<8xf32>
    %111 = vector.multi_reduction <maximumf>, %110, %cst_38 [1] : vector<8x8xf32> to vector<8xf32>
    %112 = vector.shape_cast %111 : vector<8xf32> to vector<8x1xf32>
    %113 = vector.broadcast %112 : vector<8x1xf32> to vector<8x8xf32>
    %114 = arith.subf %110, %113 : vector<8x8xf32>
    %115 = math.exp %114 : vector<8x8xf32>
    %cst_39 = arith.constant dense<0.000000e+00> : vector<8xf32>
    %116 = vector.multi_reduction <add>, %115, %cst_39 [1] : vector<8x8xf32> to vector<8xf32>
    %117 = vector.shape_cast %116 : vector<8xf32> to vector<8x1xf32>
    %118 = tpu.reciprocal %117 {approx = true} : vector<8x1xf32> -> vector<8x1xf32>
    %119 = vector.broadcast %118 : vector<8x1xf32> to vector<8x8xf32>
    %120 = arith.mulf %115, %119 : vector<8x8xf32>
    %121 = arith.truncf %120 : vector<8x8xf32> to vector<8x8xbf16>
    %122 = vector.extract_strided_slice %79 {offsets = [0, 32], sizes = [8, 32], strides = [1, 1]} : vector<8x128xbf16> to vector<8x32xbf16>
    %cst_40 = arith.constant dense<0.000000e+00> : vector<8x32xf32>
    %123 = tpu.matmul %121, %122, %cst_40 {dimension_numbers = #tpu.dot_dimension_numbers<[1], [0], [0], [1], [0, 0, 1, 1], [], []>} : vector<8x8xbf16>, vector<8x32xbf16>, vector<8x32xf32> -> vector<8x32xf32>
    %124 = arith.truncf %123 : vector<8x32xf32> to vector<8x32xbf16>
    %c32 = arith.constant 32 : index
    %c0_41 = arith.constant 0 : index
    %125 = vector.load %arg7[%c32, %c0_41] : memref<128x128xbf16, #tpu.memory_space<vmem>>, vector<32x128xbf16>
    %cst_42 = arith.constant dense<0.000000e+00> : vector<8x128xf32>
    %126 = tpu.matmul %124, %125, %cst_42 {dimension_numbers = #tpu.dot_dimension_numbers<[1], [0], [0], [1], [0, 0, 1, 1], [], []>} : vector<8x32xbf16>, vector<32x128xbf16>, vector<8x128xf32> -> vector<8x128xf32>
    %127 = arith.addf %105, %126 : vector<8x128xf32>
    %128 = vector.extract_strided_slice %77 {offsets = [0, 64], sizes = [8, 32], strides = [1, 1]} : vector<8x128xbf16> to vector<8x32xbf16>
    %129 = vector.extract_strided_slice %78 {offsets = [0, 64], sizes = [8, 32], strides = [1, 1]} : vector<8x128xbf16> to vector<8x32xbf16>
    %cst_43 = arith.constant dense<0.000000e+00> : vector<8x8xf32>
    %130 = tpu.matmul %128, %129, %cst_43 {dimension_numbers = #tpu.dot_dimension_numbers<[1], [1], [0], [0], [0, 0, 1, 0], [], []>} : vector<8x32xbf16>, vector<8x32xbf16>, vector<8x8xf32> -> vector<8x8xf32>
    %cst_44 = arith.constant -1.000000e+30 : f32
    %131 = vector.broadcast %cst_44 : f32 to vector<8x8xf32>
    %132 = arith.select %82, %130, %131 : vector<8x8xi1>, vector<8x8xf32>
    %cst_45 = arith.constant dense<0xFF800000> : vector<8xf32>
    %133 = vector.multi_reduction <maximumf>, %132, %cst_45 [1] : vector<8x8xf32> to vector<8xf32>
    %134 = vector.shape_cast %133 : vector<8xf32> to vector<8x1xf32>
    %135 = vector.broadcast %134 : vector<8x1xf32> to vector<8x8xf32>
    %136 = arith.subf %132, %135 : vector<8x8xf32>
    %137 = math.exp %136 : vector<8x8xf32>
    %cst_46 = arith.constant dense<0.000000e+00> : vector<8xf32>
    %138 = vector.multi_reduction <add>, %137, %cst_46 [1] : vector<8x8xf32> to vector<8xf32>
    %139 = vector.shape_cast %138 : vector<8xf32> to vector<8x1xf32>
    %140 = tpu.reciprocal %139 {approx = true} : vector<8x1xf32> -> vector<8x1xf32>
    %141 = vector.broadcast %140 : vector<8x1xf32> to vector<8x8xf32>
    %142 = arith.mulf %137, %141 : vector<8x8xf32>
    %143 = arith.truncf %142 : vector<8x8xf32> to vector<8x8xbf16>
    %144 = vector.extract_strided_slice %79 {offsets = [0, 64], sizes = [8, 32], strides = [1, 1]} : vector<8x128xbf16> to vector<8x32xbf16>
    %cst_47 = arith.constant dense<0.000000e+00> : vector<8x32xf32>
    %145 = tpu.matmul %143, %144, %cst_47 {dimension_numbers = #tpu.dot_dimension_numbers<[1], [0], [0], [1], [0, 0, 1, 1], [], []>} : vector<8x8xbf16>, vector<8x32xbf16>, vector<8x32xf32> -> vector<8x32xf32>
    %146 = arith.truncf %145 : vector<8x32xf32> to vector<8x32xbf16>
    %c64 = arith.constant 64 : index
    %c0_48 = arith.constant 0 : index
    %147 = vector.load %arg7[%c64, %c0_48] : memref<128x128xbf16, #tpu.memory_space<vmem>>, vector<32x128xbf16>
    %cst_49 = arith.constant dense<0.000000e+00> : vector<8x128xf32>
    %148 = tpu.matmul %146, %147, %cst_49 {dimension_numbers = #tpu.dot_dimension_numbers<[1], [0], [0], [1], [0, 0, 1, 1], [], []>} : vector<8x32xbf16>, vector<32x128xbf16>, vector<8x128xf32> -> vector<8x128xf32>
    %149 = arith.addf %127, %148 : vector<8x128xf32>
    %150 = vector.extract_strided_slice %77 {offsets = [0, 96], sizes = [8, 32], strides = [1, 1]} : vector<8x128xbf16> to vector<8x32xbf16>
    %151 = vector.extract_strided_slice %78 {offsets = [0, 96], sizes = [8, 32], strides = [1, 1]} : vector<8x128xbf16> to vector<8x32xbf16>
    %cst_50 = arith.constant dense<0.000000e+00> : vector<8x8xf32>
    %152 = tpu.matmul %150, %151, %cst_50 {dimension_numbers = #tpu.dot_dimension_numbers<[1], [1], [0], [0], [0, 0, 1, 0], [], []>} : vector<8x32xbf16>, vector<8x32xbf16>, vector<8x8xf32> -> vector<8x8xf32>
    %cst_51 = arith.constant -1.000000e+30 : f32
    %153 = vector.broadcast %cst_51 : f32 to vector<8x8xf32>
    %154 = arith.select %82, %152, %153 : vector<8x8xi1>, vector<8x8xf32>
    %cst_52 = arith.constant dense<0xFF800000> : vector<8xf32>
    %155 = vector.multi_reduction <maximumf>, %154, %cst_52 [1] : vector<8x8xf32> to vector<8xf32>
    %156 = vector.shape_cast %155 : vector<8xf32> to vector<8x1xf32>
    %157 = vector.broadcast %156 : vector<8x1xf32> to vector<8x8xf32>
    %158 = arith.subf %154, %157 : vector<8x8xf32>
    %159 = math.exp %158 : vector<8x8xf32>
    %cst_53 = arith.constant dense<0.000000e+00> : vector<8xf32>
    %160 = vector.multi_reduction <add>, %159, %cst_53 [1] : vector<8x8xf32> to vector<8xf32>
    %161 = vector.shape_cast %160 : vector<8xf32> to vector<8x1xf32>
    %162 = tpu.reciprocal %161 {approx = true} : vector<8x1xf32> -> vector<8x1xf32>
    %163 = vector.broadcast %162 : vector<8x1xf32> to vector<8x8xf32>
    %164 = arith.mulf %159, %163 : vector<8x8xf32>
    %165 = arith.truncf %164 : vector<8x8xf32> to vector<8x8xbf16>
    %166 = vector.extract_strided_slice %79 {offsets = [0, 96], sizes = [8, 32], strides = [1, 1]} : vector<8x128xbf16> to vector<8x32xbf16>
    %cst_54 = arith.constant dense<0.000000e+00> : vector<8x32xf32>
    %167 = tpu.matmul %165, %166, %cst_54 {dimension_numbers = #tpu.dot_dimension_numbers<[1], [0], [0], [1], [0, 0, 1, 1], [], []>} : vector<8x8xbf16>, vector<8x32xbf16>, vector<8x32xf32> -> vector<8x32xf32>
    %168 = arith.truncf %167 : vector<8x32xf32> to vector<8x32xbf16>
    %c96 = arith.constant 96 : index
    %c0_55 = arith.constant 0 : index
    %169 = vector.load %arg7[%c96, %c0_55] : memref<128x128xbf16, #tpu.memory_space<vmem>>, vector<32x128xbf16>
    %cst_56 = arith.constant dense<0.000000e+00> : vector<8x128xf32>
    %170 = tpu.matmul %168, %169, %cst_56 {dimension_numbers = #tpu.dot_dimension_numbers<[1], [0], [0], [1], [0, 0, 1, 1], [], []>} : vector<8x32xbf16>, vector<32x128xbf16>, vector<8x128xf32> -> vector<8x128xf32>
    %171 = arith.addf %149, %170 : vector<8x128xf32>
    %172 = arith.addf %171, %49 : vector<8x128xf32>
    %173 = arith.mulf %172, %172 : vector<8x128xf32>
    %cst_57 = arith.constant dense<0.000000e+00> : vector<8xf32>
    %174 = vector.multi_reduction <add>, %173, %cst_57 [1] : vector<8x128xf32> to vector<8xf32>
    %175 = vector.shape_cast %174 : vector<8xf32> to vector<8x1xf32>
    %cst_58 = arith.constant 1.280000e+02 : f32
    %176 = vector.broadcast %cst_58 : f32 to vector<8x1xf32>
    %177 = arith.divf %175, %176 : vector<8x1xf32>
    %cst_59 = arith.constant 9.99999997E-7 : f32
    %178 = vector.broadcast %cst_59 : f32 to vector<8x1xf32>
    %179 = arith.addf %177, %178 : vector<8x1xf32>
    %180 = math.rsqrt %179 : vector<8x1xf32>
    %181 = vector.broadcast %180 : vector<8x1xf32> to vector<8x128xf32>
    %182 = arith.mulf %172, %181 : vector<8x128xf32>
    %183 = vector.shape_cast %8 : vector<128xf32> to vector<1x128xf32>
    %184 = vector.broadcast %183 : vector<1x128xf32> to vector<8x128xf32>
    %185 = arith.mulf %182, %184 : vector<8x128xf32>
    %c0_60 = arith.constant 0 : index
    %c0_61 = arith.constant 0 : index
    %186 = vector.load %arg8[%c0_60, %c0_61] : memref<128x512xbf16, #tpu.memory_space<vmem>>, vector<128x512xbf16>
    %187 = arith.truncf %185 : vector<8x128xf32> to vector<8x128xbf16>
    %cst_62 = arith.constant dense<0.000000e+00> : vector<8x512xf32>
    %188 = tpu.matmul %187, %186, %cst_62 {dimension_numbers = #tpu.dot_dimension_numbers<[1], [0], [0], [1], [0, 0, 1, 1], [], []>} : vector<8x128xbf16>, vector<128x512xbf16>, vector<8x512xf32> -> vector<8x512xf32>
    %189 = vector.extract_strided_slice %188 {offsets = [0, 0], sizes = [8, 256], strides = [1, 1]} : vector<8x512xf32> to vector<8x256xf32>
    %190 = vector.extract_strided_slice %188 {offsets = [0, 256], sizes = [8, 256], strides = [1, 1]} : vector<8x512xf32> to vector<8x256xf32>
    %191 = arith.negf %189 : vector<8x256xf32>
    %192 = math.exp %191 : vector<8x256xf32>
    %cst_63 = arith.constant 1.000000e+00 : f32
    %193 = vector.broadcast %cst_63 : f32 to vector<8x256xf32>
    %194 = arith.addf %193, %192 : vector<8x256xf32>
    %195 = arith.divf %193, %194 : vector<8x256xf32>
    %196 = arith.mulf %189, %195 : vector<8x256xf32>
    %197 = arith.mulf %196, %190 : vector<8x256xf32>
    %c0_64 = arith.constant 0 : index
    %c0_65 = arith.constant 0 : index
    %198 = vector.load %arg9[%c0_64, %c0_65] : memref<256x128xbf16, #tpu.memory_space<vmem>>, vector<256x128xbf16>
    %199 = arith.truncf %197 : vector<8x256xf32> to vector<8x256xbf16>
    %cst_66 = arith.constant dense<0.000000e+00> : vector<8x128xf32>
    %200 = tpu.matmul %199, %198, %cst_66 {dimension_numbers = #tpu.dot_dimension_numbers<[1], [0], [0], [1], [0, 0, 1, 1], [], []>} : vector<8x256xbf16>, vector<256x128xbf16>, vector<8x128xf32> -> vector<8x128xf32>
    %201 = arith.addf %200, %172 : vector<8x128xf32>
    %202 = arith.mulf %201, %201 : vector<8x128xf32>
    %cst_67 = arith.constant dense<0.000000e+00> : vector<8xf32>
    %203 = vector.multi_reduction <add>, %202, %cst_67 [1] : vector<8x128xf32> to vector<8xf32>
    %204 = vector.shape_cast %203 : vector<8xf32> to vector<8x1xf32>
    %cst_68 = arith.constant 1.280000e+02 : f32
    %205 = vector.broadcast %cst_68 : f32 to vector<8x1xf32>
    %206 = arith.divf %204, %205 : vector<8x1xf32>
    %cst_69 = arith.constant 9.99999997E-7 : f32
    %207 = vector.broadcast %cst_69 : f32 to vector<8x1xf32>
    %208 = arith.addf %206, %207 : vector<8x1xf32>
    %209 = math.rsqrt %208 : vector<8x1xf32>
    %210 = vector.broadcast %209 : vector<8x1xf32> to vector<8x128xf32>
    %211 = arith.mulf %201, %210 : vector<8x128xf32>
    %212 = vector.shape_cast %10 : vector<128xf32> to vector<1x128xf32>
    %213 = vector.broadcast %212 : vector<1x128xf32> to vector<8x128xf32>
    %214 = arith.mulf %211, %213 : vector<8x128xf32>
    tpu.wait_dma2 semaphore(%arg13 : memref<!tpu.dma_semaphore, #tpu.memory_space<semaphore_mem>>) src(%arg10 : memref<128x512xbf16, #tpu.memory_space<any>>) dst(%arg12 : memref<128x512xbf16, #tpu.memory_space<vmem>>)
    %c0_70 = arith.constant 0 : index
    %c0_71 = arith.constant 0 : index
    %215 = vector.load %arg12[%c0_70, %c0_71] : memref<128x512xbf16, #tpu.memory_space<vmem>>, vector<128x512xbf16>
    %216 = arith.truncf %214 : vector<8x128xf32> to vector<8x128xbf16>
    %cst_72 = arith.constant dense<0.000000e+00> : vector<8x512xf32>
    %217 = tpu.matmul %216, %215, %cst_72 {dimension_numbers = #tpu.dot_dimension_numbers<[1], [0], [0], [1], [0, 0, 1, 1], [], []>} : vector<8x128xbf16>, vector<128x512xbf16>, vector<8x512xf32> -> vector<8x512xf32>
    %c0_73 = arith.constant 0 : index
    %c0_74 = arith.constant 0 : index
    %218 = vector.load %arg11[%c0_73, %c0_74] : memref<8x512xf32, #tpu.memory_space<vmem>>, vector<8x512xf32>
    tpu.vector_store %arg11[%c0_73, %c0_74], %217 {strides = array<i32>} : memref<8x512xf32, #tpu.memory_space<vmem>>, vector<8x512xf32>,
    return
  }
}

</mosaic_0001>

<bundles_post_ra>
// kernel: deepseek_v3_mtp_forward.1
= control target key start
LH: loop header
LB: loop body
LE: loop exit
PB: predicated region body
PF: predicated region fallthrough
CT: control target
= control target key end

     0   :  { %16 = vsyncpa [#allocation5], 0  ;;  %s3311_s0 = inlined_call_operand.vmem [shape: f32[8,128], index: 0, kind: input, shape index: {}]   ;;  %s3312_s1 = inlined_call_operand.vmem [shape: f32[8,128], index: 1, kind: input, shape index: {}]   ;;  %s3313_s2 = inlined_call_operand.vmem [shape: f32[2,8,128], index: 2, kind: input, shape index: {}]   ;;  %s3314_s3 = inlined_call_operand.vmem [shape: f32[8,128], index: 3, kind: input, shape index: {}]   ;;  %s3315_s4 = inlined_call_operand.hbm [shape: bf16[128,128], index: 4, kind: input, shape index: {}]   ;;  %s3316_s5 = inlined_call_operand.hbm [shape: bf16[128,128], index: 5, kind: input, shape index: {}]   ;;  %s3317_s6 = inlined_call_operand.vmem [shape: bf16[128,640], index: 6, kind: input, shape index: {}]   ;;  %s3318_s7 = inlined_call_operand.hbm [shape: bf16[128,128], index: 7, kind: input, shape index: {}]   ;;  %s3319_s8 = inlined_call_operand.hbm [shape: bf16[128,512], index: 8, kind: input, shape index: {}]   ;;  %s3320_s9 = inlined_call_operand.hbm [shape: bf16[256,128], index: 9, kind: input, shape index: {}]   ;;  %s3321_s10 = inlined_call_operand.hbm [shape: bf16[128,512], index: 10, kind: input, shape index: {}]   ;;  %s3322_s11 = inlined_call_operand.hbm [shape: f32[8,512], index: 11, kind: output, shape index: {}]  }
   0x1   :  { %17 = vsyncpa [#allocation8], 0 }
   0x2   :  { %18 = vsyncpa [#allocation11], 0 }
   0x3   :  { %19 = vsyncpa [#allocation6], 0  ;;  %s2798_s17 = smov [#allocation7]   ;;  %s2799_s19 = smov [#allocation10]  }
   0x4   :  { %s45_s18 = sshll.u32 %s2798_s17, 4  ;;  %s71_s20 = sshll.u32 %s2799_s19, 4  ;;  %s46_s18 = int_to_ptr.vmem [resolvable:$true] %s45_s18  ;;  %s2879_s20 = int_to_ptr.vmem [resolvable:$true] %s71_s20 }
   0x5   :  { %s2656_s23 = scalar_lea.hbm %s3316_s5, 1024 }
   0x6   :  { %p2657_p0 = scmp.ne.s32.totalorder %s3316_s5, %s2656_s23  ;;  %p2660_p1 = scmp.lt.u32.totalorder %s2656_s23, %s3316_s5 }
   0x8   :  { %p2662_p2 = pnand %p2660_p1, %p2657_p0 }
   0xa   :  { %2665 = shalt.err (!%p2662_p2)
}
   0xb   :  { %s2666_s28 = scalar_lea.vmem %s46_s18, 1024  ;;  %p2671_p4 = scmp.lt.s32.totalorder %s46_s18, %s46_s18 }
   0xc   :  { %p2667_p3 = scmp.ne.s32.totalorder %s46_s18, %s2666_s28  ;;  %p2672_p5 = scmp.lt.s32.totalorder %s2666_s28, %s2666_s28 }
   0xe   :  { %p2673_p6 = por %p2672_p5, %p2671_p4 }
  0x10   :  { %p2674_p7 = pnand %p2673_p6, %p2667_p3 }
  0x12   :  { %2677 = shalt.err (!%p2674_p7)
}
  0x13   :  { %s2800_s29 = smov 64   ;;  %s2801_s30 = smov 4  }
  0x14   :  { %51 = dma.hbm_to_vmem [thread:$0]  %s3316_s5, 1024, %s46_s18, [#allocation8], %s2800_s29, %s2800_s29, %s2801_s30  }
  0x15   :  { %s2678_s16 = scalar_lea.hbm %s3319_s8, 4096 }
  0x16   :  { %p2679_p8 = scmp.ne.s32.totalorder %s3319_s8, %s2678_s16  ;;  %p2682_p9 = scmp.lt.u32.totalorder %s2678_s16, %s3319_s8 }
  0x18   :  { %p2684_p10 = pnand %p2682_p9, %p2679_p8 }
  0x1a   :  { %2687 = shalt.err (!%p2684_p10)
}
  0x1b   :  { %s2688_s23 = scalar_lea.vmem %s2879_s20, 4096  ;;  %p2693_p12 = scmp.lt.s32.totalorder %s2879_s20, %s2879_s20 }
  0x1c   :  { %p2689_p11 = scmp.ne.s32.totalorder %s2879_s20, %s2688_s23  ;;  %p2694_p13 = scmp.lt.s32.totalorder %s2688_s23, %s2688_s23 }
  0x1e   :  { %p2695_p0 = por %p2694_p13, %p2693_p12 }
  0x20   :  { %p2696_p1 = pnand %p2695_p0, %p2689_p11 }
  0x22   :  { %2699 = shalt.err (!%p2696_p1)
}
  0x23   :  { %s2802_s5 = smov 256   ;;  %s2803_s18 = smov 16  }
  0x24   :  { %77 = dma.hbm_to_vmem [thread:$0]  %s3319_s8, 4096, %s2879_s20, [#allocation11], %s2802_s5, %s2802_s5, %s2803_s18  }
  0x25   :  { %s2804_s26 = smov [#allocation4]   ;;  %s2805_s28 = smov [#allocation9]  }
  0x26   :  { %s33_s27 = sshll.u32 %s2804_s26, 4  ;;  %s59_s12 = sshll.u32 %s2805_s28, 4  ;;  %s34_s27 = int_to_ptr.vmem [resolvable:$true] %s33_s27  ;;  %s2915_s12 = int_to_ptr.vmem [resolvable:$true] %s59_s12 }
  0x27   :  { %s2700_s15 = scalar_lea.hbm %s3315_s4, 1024 }
  0x28   :  { %p2701_p2 = scmp.ne.s32.totalorder %s3315_s4, %s2700_s15  ;;  %p2704_p3 = scmp.lt.u32.totalorder %s2700_s15, %s3315_s4 }
  0x2a   :  { %p2706_p4 = pnand %p2704_p3, %p2701_p2 }
  0x2c   :  { %2709 = shalt.err (!%p2706_p4)
}
  0x2d   :  { %s2710_s8 = scalar_lea.vmem %s34_s27, 1024  ;;  %p2715_p6 = scmp.lt.s32.totalorder %s34_s27, %s34_s27 }
  0x2e   :  { %p2711_p5 = scmp.ne.s32.totalorder %s34_s27, %s2710_s8  ;;  %p2716_p7 = scmp.lt.s32.totalorder %s2710_s8, %s2710_s8 }
  0x30   :  { %p2717_p8 = por %p2716_p7, %p2715_p6 }
  0x32   :  { %p2718_p9 = pnand %p2717_p8, %p2711_p5 }
  0x34   :  { %2721 = shalt.err (!%p2718_p9)
}
  0x35   :  { %39 = dma.hbm_to_vmem [thread:$0]  %s3315_s4, 1024, %s34_s27, [#allocation5], %s2800_s29, %s2800_s29, %s2801_s30  }
  0x36   :  { %s2722_s24 = scalar_lea.hbm %s3318_s7, 1024 }
  0x37   :  { %p2723_p10 = scmp.ne.s32.totalorder %s3318_s7, %s2722_s24  ;;  %p2726_p11 = scmp.lt.u32.totalorder %s2722_s24, %s3318_s7 }
  0x39   :  { %p2728_p12 = pnand %p2726_p11, %p2723_p10 }
  0x3b   :  { %2731 = shalt.err (!%p2728_p12)
}
  0x3c   :  { %s2732_s14 = scalar_lea.vmem %s2915_s12, 1024  ;;  %p2737_p0 = scmp.lt.s32.totalorder %s2915_s12, %s2915_s12 }
  0x3d   :  { %p2733_p13 = scmp.ne.s32.totalorder %s2915_s12, %s2732_s14  ;;  %p2738_p1 = scmp.lt.s32.totalorder %s2732_s14, %s2732_s14 }
  0x3f   :  { %p2739_p2 = por %p2738_p1, %p2737_p0 }
  0x41   :  { %p2740_p3 = pnand %p2739_p2, %p2733_p13 }
  0x43   :  { %2743 = shalt.err (!%p2740_p3)
}
  0x44   :  { %65 = dma.hbm_to_vmem [thread:$0]  %s3318_s7, 1024, %s2915_s12, [#allocation8], %s2800_s29, %s2800_s29, %s2801_s30  }
  0x45   :  { %s2806_s15 = smov [#allocation12]   ;;  %s2744_s21 = scalar_lea.hbm %s3320_s9, 2048 }
  0x46   :  { %s83_s16 = sshll.u32 %s2806_s15, 4  ;;  %p2745_p4 = scmp.ne.s32.totalorder %s3320_s9, %s2744_s21  ;;  %s84_s16 = int_to_ptr.vmem [resolvable:$true] %s83_s16 }
  0x47   :  { %p2748_p5 = scmp.lt.u32.totalorder %s2744_s21, %s3320_s9 }
  0x49   :  { %p2750_p6 = pnand %p2748_p5, %p2745_p4 }
  0x4b   :  { %2753 = shalt.err (!%p2750_p6)
}
  0x4c   :  { %s2754_s18 = scalar_lea.vmem %s84_s16, 2048  ;;  %p2759_p8 = scmp.lt.s32.totalorder %s84_s16, %s84_s16 }
  0x4d   :  { %p2755_p7 = scmp.ne.s32.totalorder %s84_s16, %s2754_s18  ;;  %p2760_p9 = scmp.lt.s32.totalorder %s2754_s18, %s2754_s18 }
  0x4f   :  { %p2761_p10 = por %p2760_p9, %p2759_p8 }
  0x51   :  { %p2762_p11 = pnand %p2761_p10, %p2755_p7 }
  0x53   :  { %2765 = shalt.err (!%p2762_p11)
}
  0x54   :  { %89 = dma.hbm_to_vmem [thread:$0]  %s3320_s9, 2048, %s84_s16, [#allocation11], %s2800_s29, %s2800_s29, %s2801_s30  }
  0x55   :  { %2788 = dma.done.wait [#allocation5], 1024  }
  0x56   :  { %2789 = vsyncadd [#allocation5], 4294966272 }
  0x57   :  { %2790 = dma.done.wait [#allocation8], 2048  }
  0x58   :  { %2791 = vsyncadd [#allocation8], 4294965248 }
  0x59   :  { %2792 = dma.done.wait [#allocation11], 6144  }
  0x5a   :  { %2793 = vsyncadd [#allocation11], 4294961152  ;;  %s110_s24 = sld [smem:[#allocation0]]   ;;  %s2807_s25 = smov 512   ;;  %v2808_v0 = vmov 0.0   ;;  %vm2814_vm0 = vmmov 0   ;;  %v154_v15 = vlaneseq }
  0x5b   :  { %122 = sst [smem:[#allocation15]] %s2807_s25  ;;  %2312 = vmatprep.subr.bf16.mxu0 %v2808_v0  ;;  %s2809_s26 = smov [#allocation2]   ;;  %2328 = vmatprep.mubr.msk.bf16.mxu0 %vm2814_vm0, %v2808_v0  ;;  %vm787_vm1 = vcmask 261120   ;;  %vm851_vm2 = vcmask 1043456   ;;  %vm835_vm4 = vcmask 64512  }
  0x5c   :  { %124 = sst [smem:[#allocation15 + $0x1]] %s2807_s25  ;;  %s118_s28 = sshll.u32 %s2809_s26, 4  ;;  %v2997_v17 = vshrl.u32 %v154_v15, 7  ;;  %s119_s28 = int_to_ptr.vmem [resolvable:$true] %s118_s28 }
  0x5d   :  { %126 = sst [smem:[#allocation15 + $0x2]] %s2801_s30  ;;  %s2810_s9 = smov 128  }
  0x5e   :  { %128 = sst [smem:[#allocation15 + $0x3]] %s2800_s29  ;;  %s2811_s13 = smov 2   ;;  %v169_v18 = vsub.s32 1, %v2997_v17  ;;  %v156_v33 = vsub.s32 0, %v2997_v17 }
  0x5f   :  { %130 = sst [smem:[#allocation15 + $0x4]] %s2810_s9  ;;  %s2812_s27 = smov [#allocation3]  }
  0x60   :  { %132 = sst [smem:[#allocation15 + $0x5]] %s2811_s13  ;;  %s2105_s14 = sshll.u32 %s110_s24, 26 }
  0x61   :  { %134 = sst [smem:[#allocation15 + $0x6]] %s2802_s5  ;;  %s2106_s4 = sadd.s32 134217728, %s2105_s14 }
  0x62   :  { %136 = sst [smem:[#allocation15 + $0x7]] %s2800_s29  ;;  %s2813_s15 = smov [#allocation14]  }
  0x63   :  { %138 = sst [smem:[#allocation15 + $0x8]] %s2801_s30 }
  0x64   :  { %140 = dma.general %s3321_s10, 4096, %s119_s28, %s2812_s27, %s2813_s15, [#allocation15], %s2106_s4, 0  }
  0x65   :  { %v159_v1 = vld [vmem:[%s3312_s1] sm:$0xff]  ;;  %v2478_v6 = vld [vmem:[#allocation7 + $0x8] sm:$0xff]   ;;  %v2479_v7 = vld [vmem:[#allocation7 + $0x10] sm:$0xff]  }
  0x66   :  { %v2982_v2 = vld [vmem:[%s3311_s0] sm:$0xff]  ;;  %v160_v3 = vmul.f32 %v159_v1, %v159_v1  ;;  %v2480_v8 = vld [vmem:[#allocation7 + $0x18] sm:$0xff]   ;;  %v2482_v10 = vld [vmem:[#allocation7 + $0x28] sm:$0xff]  }
  0x67   :  { %v2477_v4 = vld [vmem:[#allocation7] sm:$0xff]   ;;  %v146_v5 = vmul.f32 %v2982_v2, %v2982_v2  ;;  %v2483_v11 = vld [vmem:[#allocation7 + $0x30] sm:$0xff]   ;;  %v2484_v12 = vld [vmem:[#allocation7 + $0x38] sm:$0xff]  }
  0x68   :  { %161 = vadd.xlane.f32.xlu0 %v160_v3  ;;  %2313 = vmatpush3.bf16.msra.mxu0 %v2477_v4  ;;  %v2481_v9 = vld [vmem:[#allocation7 + $0x20] sm:$0xff]   ;;  %v2486_v28 = vld [vmem:[#allocation4 + $0x8] sm:$0xff]   ;;  %v2487_v30 = vld [vmem:[#allocation4 + $0x10] sm:$0xff]   ;;  %v2815_v3 = vmov 0  }
  0x69   :  { %2314 = vmatprep.subr.bf16.mxu0 %v2808_v0  ;;  %v3003_v19 = vld [vmem:[%s3314_s3] sm:$0xff]  ;;  %v2488_v31 = vld [vmem:[#allocation4 + $0x18] sm:$0xff]   ;;  %v2490_v35 = vld [vmem:[#allocation4 + $0x28] sm:$0xff]   ;;  %683 = vmatprep.mubr.bf16.mxu1 %v2815_v3 }
  0x6a   :  { %v170_v20 = vrot.slane %v3003_v19, %v169_v18  ;;  %v2485_v25 = vld [vmem:[#allocation4] sm:$0xff]   ;;  %v157_v37 = vrot.slane %v3003_v19, %v156_v33  ;;  %v2491_v38 = vld [vmem:[#allocation4 + $0x30] sm:$0xff]   ;;  %v2492_v40 = vld [vmem:[#allocation4 + $0x38] sm:$0xff]  }
  0x6b   :  { %v2489_v32 = vld [vmem:[#allocation4 + $0x20] sm:$0xff]   ;;  %v2500_v46 = vld [vmem:[%s3317_s6 + $0x38] ss:$20 sps:$4 sm:$0xff]   ;;  %v2499_v47 = vld [vmem:[%s3317_s6 + $0x28] ss:$20 sps:$4 sm:$0xff]  }
  0x6c   :  { %147 = vadd.xlane.f32.xlu0 %v146_v5  ;;  %2315 = vmatpush3.bf16.msra.mxu0 %v2478_v6  ;;  %v2493_v42 = vld [vmem:[%s3317_s6 + $0x4] ss:$20 sps:$4 sm:$0xff]   ;;  %v2495_v43 = vld [vmem:[%s3317_s6] ss:$20 sps:$4 sm:$0xff]   ;;  %v2505_v56 = vld [vmem:[%s3317_s6 + $0x7c] ss:$20 sps:$4 sm:$0xff]  }
  0x6d   :  { %2316 = vmatprep.subr.bf16.mxu0 %v2808_v0  ;;  %v2496_v44 = vld [vmem:[%s3317_s6 + $0x10] ss:$20 sps:$4 sm:$0xff]   ;;  %v2497_v45 = vld [vmem:[%s3317_s6 + $0x2c] ss:$20 sps:$4 sm:$0xff]   ;;  %651 = vmatprep.subr.bf16.mxu1 %v2493_v42  ;;  %v2501_v48 = vld [vmem:[%s3317_s6 + $0x54] ss:$20 sps:$4 sm:$0xff]  }
  0x6e   :  { %652 = vmatpush1.bf16.msra.mxu1 %v2495_v43  ;;  %v2504_v49 = vld [vmem:[%s3317_s6 + $0x60] ss:$20 sps:$4 sm:$0xff]   ;;  %v2503_v50 = vld [vmem:[%s3317_s6 + $0x50] ss:$20 sps:$4 sm:$0xff]   ;;  %v2507_v57 = vld [vmem:[%s3317_s6 + $0x78] ss:$20 sps:$4 sm:$0xff]  }
  0x6f   :  { %653 = vmatprep.subr.bf16.mxu1 %v2497_v45  ;;  %v2508_v58 = vld [vmem:[%s3317_s6 + $0x88] ss:$20 sps:$4 sm:$0xff]   ;;  %v2509_v59 = vld [vmem:[%s3317_s6 + $0xa4] ss:$20 sps:$4 sm:$0xff]   ;;  %v2511_v60 = vld [vmem:[%s3317_s6 + $0xa0] ss:$20 sps:$4 sm:$0xff]  }
  0x70   :  { %2317 = vmatpush3.bf16.msra.mxu0 %v2479_v7  ;;  %v2512_v61 = vld [vmem:[%s3317_s6 + $0xb0] ss:$20 sps:$4 sm:$0xff]   ;;  %v2513_v62 = vld [vmem:[%s3317_s6 + $0xcc] ss:$20 sps:$4 sm:$0xff]   ;;  %v2515_v63 = vld [vmem:[%s3317_s6 + $0xc8] ss:$20 sps:$4 sm:$0xff]  }
  0x71   :  { %2318 = vmatprep.subr.bf16.mxu0 %v2808_v0  ;;  %v2519_v4 = vld [vmem:[%s3317_s6 + $0xf0] ss:$20 sps:$4 sm:$0xff]   ;;  %v2520_v5 = vld [vmem:[%s3317_s6 + $0x100] ss:$20 sps:$4 sm:$0xff]   ;;  %v2523_v7 = vld [vmem:[%s3317_s6 + $0x118] ss:$20 sps:$4 sm:$0xff]  }
  0x72   :  { %654 = vmatpush1.bf16.msra.mxu1 %v2499_v47  ;;  %v2521_v6 = vld [vmem:[%s3317_s6 + $0x11c] ss:$20 sps:$4 sm:$0xff]  }
  0x73   :  { %655 = vmatprep.subr.bf16.mxu1 %v2501_v48  ;;  %v2545_v33 = vld [vmem:[%s3317_s6 + $0xfc] ss:$20 sps:$4 sm:$0xff]  }
  0x74   :  { %2319 = vmatpush3.bf16.msra.mxu0 %v2480_v8  ;;  %v2524_v8 = vld [vmem:[%s3317_s6 + $0x128] ss:$20 sps:$4 sm:$0xff]  }
  0x75   :  { %2320 = vmatprep.subr.bf16.mxu0 %v2808_v0 }
  0x76   :  { %656 = vmatpush1.bf16.msra.mxu1 %v2503_v50 }
  0x77   :  { %657 = vmatprep.subr.bf16.mxu1 %v2505_v56 }
  0x78   :  { %2321 = vmatpush3.bf16.msra.mxu0 %v2481_v9  ;;  %v2527_v9 = vld [vmem:[%s3317_s6 + $0xc] ss:$20 sps:$4 sm:$0xff]  }
  0x79   :  { %2322 = vmatprep.subr.bf16.mxu0 %v2808_v0 }
  0x7a   :  { %658 = vmatpush1.bf16.msra.mxu1 %v2507_v57 }
  0x7b   :  { %659 = vmatprep.subr.bf16.mxu1 %v2509_v59 }
  0x7c   :  { %2323 = vmatpush3.bf16.msra.mxu0 %v2482_v10 }
  0x7d   :  { %2324 = vmatprep.subr.bf16.mxu0 %v2808_v0 }
  0x7e   :  { %660 = vmatpush1.bf16.msra.mxu1 %v2511_v60 }
  0x7f   :  { %661 = vmatprep.subr.bf16.mxu1 %v2513_v62 }
  0x80   :  { %2325 = vmatpush3.bf16.msra.mxu0 %v2483_v11 }
  0x81   :  { %2326 = vmatprep.subr.bf16.mxu0 %v2808_v0 }
  0x82   :  { %662 = vmatpush1.bf16.msra.mxu1 %v2515_v63  ;;  %v3186_v63 = vand.u32 127, %v154_v15 }
  0x84   :  { %2327 = vmatpush3.bf16.msra.mxu0 %v2484_v12  ;;  %vm786_vm3 = vcmp.le.s32.totalorder %v3186_v63, %v2997_v17 }
  0x85   :  { %2332 = vmatprep.subr.bf16.mxu0 %v2808_v0 }
  0xf5   :  { %v162_v13 = vpop.xlane.xlu0 %161 }
  0xf6   :  { %v163_v14 = vmul.f32 0.0078125, %v162_v13  ;;  %v391_v13 = vsub.s32 2, %v2997_v17 }
  0xf8   :  { %v164_v16 = vadd.f32 1e-06, %v163_v14  ;;  %v392_v14 = vrot.slane %v3003_v19, %v391_v13 }
  0xf9   :  { %v148_v24 = vpop.xlane.xlu0 %147 }
  0xfa   :  { %2621 = vrsqrt.f32 %v164_v16  ;;  %v150_v27 = vmul.f32 0.0078125, %v148_v24  ;;  %v2528_v24 = vld [vmem:[%s3317_s6 + $0x30] ss:$20 sps:$4 sm:$0xff]  }
  0xfc   :  { %v151_v29 = vadd.f32 1e-06, %v150_v27  ;;  %v2536_v27 = vld [vmem:[%s3317_s6 + $0x84] ss:$20 sps:$4 sm:$0xff]  }
  0xfe   :  { %2623 = vrsqrt.f32 %v151_v29  ;;  %v2539_v29 = vld [vmem:[%s3317_s6 + $0xac] ss:$20 sps:$4 sm:$0xff]  }
 0x104   :  { %v2622_v21 = vpop.eup %2621 }
 0x105   :  { %v166_v22 = vmul.f32 %v2622_v21, %v159_v1  ;;  %v2516_v1 = vld [vmem:[%s3317_s6 + $0xd8] ss:$20 sps:$4 sm:$0xff]   ;;  %v2525_v21 = vld [vmem:[%s3317_s6 + $0x8] ss:$20 sps:$4 sm:$0xff]  }
 0x107   :  { %v171_v23 = vmul.f32 %v170_v20, %v166_v22 }
 0x108   :  { %v2624_v34 = vpop.eup %2623 }
 0x109   :  { %v205_v26 = vpack.c.bf16 %v171_v23, %v171_v23  ;;  %v153_v36 = vmul.f32 %v2624_v34, %v2982_v2  ;;  %v2517_v2 = vld [vmem:[%s3317_s6 + $0xf4] ss:$20 sps:$4 sm:$0xff]   ;;  %v2543_v34 = vld [vmem:[%s3317_s6 + $0xf8] ss:$20 sps:$4 sm:$0xff]  }
 0x10a   :  { %663 = vmatprep.subr.bf16.mxu1 %v2517_v2  ;;  %v2530_v23 = vld [vmem:[%s3317_s6 + $0x34] ss:$20 sps:$4 sm:$0xff]  }
 0x10b   :  { %2329 = vmatmul.mubr.bf16.vlgmr.msra.gmra.mrb[0].mxu0 %v205_v26  ;;  %v158_v39 = vmul.f32 %v157_v37, %v153_v36  ;;  %664 = vmatpush1.bf16.msra.mxu1 %v2519_v4  ;;  %v2531_v26 = vld [vmem:[%s3317_s6 + $0x58] ss:$20 sps:$4 sm:$0xff]   ;;  %v2546_v36 = vld [vmem:[%s3317_s6 + $0x120] ss:$20 sps:$4 sm:$0xff]  }
 0x10c   :  { %2333 = vmatpush3.bf16.msra.mxu0 %v2485_v25  ;;  %2348 = vmatprep.mubr.msk.bf16.mxu0 %vm2814_vm0, %v2808_v0  ;;  %v2533_v25 = vld [vmem:[%s3317_s6 + $0x5c] ss:$20 sps:$4 sm:$0xff]   ;;  %v142_v37 = vld [vmem:[%s3313_s2] sm:$0xff] }
 0x10d   :  { %2334 = vmatprep.subr.bf16.mxu0 %v2808_v0  ;;  %v188_v41 = vpack.c.bf16 %v158_v39, %v158_v39  ;;  %665 = vmatprep.subr.bf16.mxu1 %v2521_v6 }
 0x10f   :  { %666 = vmatpush1.bf16.msra.mxu1 %v2523_v7 }
 0x110   :  { %2335 = vmatpush3.bf16.msra.mxu0 %v2486_v28  ;;  %692 = vmatprep.subr.bf16.mxu1 %v2527_v9  ;;  %v2534_v28 = vld [vmem:[%s3317_s6 + $0x80] ss:$20 sps:$4 sm:$0xff]  }
 0x111   :  { %2336 = vmatprep.subr.bf16.mxu0 %v2808_v0 }
 0x114   :  { %2337 = vmatpush3.bf16.msra.mxu0 %v2487_v30  ;;  %v2537_v30 = vld [vmem:[%s3317_s6 + $0xa8] ss:$20 sps:$4 sm:$0xff]  }
 0x115   :  { %2338 = vmatprep.subr.bf16.mxu0 %v2808_v0 }
 0x118   :  { %2339 = vmatpush3.bf16.msra.mxu0 %v2488_v31  ;;  %v2542_v31 = vld [vmem:[%s3317_s6 + $0xd4] ss:$20 sps:$4 sm:$0xff]  }
 0x119   :  { %2340 = vmatprep.subr.bf16.mxu0 %v2808_v0 }
 0x11c   :  { %2341 = vmatpush3.bf16.msra.mxu0 %v2489_v32  ;;  %v2540_v32 = vld [vmem:[%s3317_s6 + $0xd0] ss:$20 sps:$4 sm:$0xff]  }
 0x11d   :  { %2342 = vmatprep.subr.bf16.mxu0 %v2808_v0 }
 0x120   :  { %2343 = vmatpush3.bf16.msra.mxu0 %v2490_v35  ;;  %v2548_v35 = vld [vmem:[%s3317_s6 + $0x124] ss:$20 sps:$4 sm:$0xff]   ;;  %s2817_s6 = smov 32  }
 0x121   :  { %2344 = vmatprep.subr.bf16.mxu0 %v2808_v0 }
 0x124   :  { %2345 = vmatpush3.bf16.msra.mxu0 %v2491_v38  ;;  %v2107_v38 = vld [vmem:[%s3313_s2 + $0x8] sm:$0xff]  ;;  %s2816_s2 = smov 96  }
 0x125   :  { %2346 = vmatprep.subr.bf16.mxu0 %v2808_v0 }
 0x128   :  { %2347 = vmatpush3.bf16.msra.mxu0 %v2492_v40 }
 0x129   :  { %2352 = vmatprep.subr.bf16.mxu0 %v2808_v0 }
 0x12b   :  { %2349 = vmatmul.mubr.bf16.vlgmr.msra.gmra.mrb[0].mxu0 %v188_v41 }
 0x12c   :  { %2368 = vmatprep.mubr.msk.bf16.mxu0 %vm2814_vm0, %v2808_v0  ;;  %2353 = vmatpush3.bf16.msra.mxu0 %v2496_v44 }
 0x12d   :  { %2354 = vmatprep.subr.bf16.mxu0 %v2808_v0 }
 0x130   :  { %2355 = vmatpush3.bf16.msra.mxu0 %v2500_v46 }
 0x131   :  { %2356 = vmatprep.subr.bf16.mxu0 %v2808_v0 }
 0x134   :  { %2357 = vmatpush3.bf16.msra.mxu0 %v2504_v49 }
 0x135   :  { %2358 = vmatprep.subr.bf16.mxu0 %v2808_v0 }
 0x138   :  { %2359 = vmatpush3.bf16.msra.mxu0 %v2508_v58 }
 0x139   :  { %2360 = vmatprep.subr.bf16.mxu0 %v2808_v0 }
 0x13c   :  { %2361 = vmatpush3.bf16.msra.mxu0 %v2512_v61 }
 0x13d   :  { %2362 = vmatprep.subr.bf16.mxu0 %v2808_v0 }
 0x140   :  { %2363 = vmatpush3.bf16.msra.mxu0 %v2516_v1 }
 0x141   :  { %2364 = vmatprep.subr.bf16.mxu0 %v2808_v0 }
 0x144   :  { %2365 = vmatpush3.bf16.msra.mxu0 %v2520_v5 }
 0x145   :  { %2366 = vmatprep.subr.bf16.mxu0 %v2808_v0 }
 0x148   :  { %2367 = vmatpush3.bf16.msra.mxu0 %v2524_v8 }
 0x149   :  { %2424 = vmatprep.subr.bf16.mxu0 %v2808_v0 }
 0x1fe   :  { %v3051_v51 = vpop.f32.mrb[0].mxu0 }
 0x1ff   :  { %v2350_v52 = vpop.f32.mrb[1].mxu0  ;;  %v382_v53 = vmul.f32 %v3051_v51, %v3051_v51 }
 0x200   :  { %v379_v54 = vpop.f32.mrb[2].mxu0 }
 0x201   :  { %383 = vadd.xlane.f32.xlu1 %v382_v53  ;;  %v2351_v55 = vpop.f32.mrb[3].mxu0 }
 0x28e   :  { %v384_v10 = vpop.xlane.xlu1 %383 }
 0x28f   :  { %v385_v11 = vmul.f32 0.0078125, %v384_v10 }
 0x291   :  { %v386_v12 = vadd.f32 1e-06, %v385_v11 }
 0x293   :  { %2625 = vrsqrt.f32 %v386_v12 }
 0x29d   :  { %v2626_v16 = vpop.eup %2625 }
 0x29e   :  { %v388_v18 = vmul.f32 %v2626_v16, %v3051_v51 }
 0x2a0   :  { %v393_v20 = vmul.f32 %v392_v14, %v388_v18 }
 0x2a2   :  { %v442_v22 = vpack.c.bf16 %v393_v20, %v393_v20 }
 0x2a4   :  { %684 = vmatmul.mubr.bf16.vlgmr.msra.gmra.mrb[0].mxu1 %v442_v22  ;;  %2369 = vmatmul.mubr.bf16.vlgmr.msra.gmra.mrb[4].mxu0 %v442_v22 }
 0x2a5   :  { %693 = vmatpush1.bf16.msra.mxu1 %v2525_v21  ;;  %724 = vmatprep.mubr.bf16.mxu1 %v2815_v3 }
 0x2a6   :  { %694 = vmatprep.subr.bf16.mxu1 %v2530_v23  ;;  %2428 = vmatprep.mubr.msk.bf16.mxu0 %vm2814_vm0, %v2808_v0 }
 0x2a9   :  { %695 = vmatpush1.bf16.msra.mxu1 %v2528_v24 }
 0x2aa   :  { %696 = vmatprep.subr.bf16.mxu1 %v2533_v25 }
 0x2ad   :  { %697 = vmatpush1.bf16.msra.mxu1 %v2531_v26 }
 0x2ae   :  { %698 = vmatprep.subr.bf16.mxu1 %v2536_v27 }
 0x2b1   :  { %699 = vmatpush1.bf16.msra.mxu1 %v2534_v28 }
 0x2b2   :  { %700 = vmatprep.subr.bf16.mxu1 %v2539_v29 }
 0x2b5   :  { %701 = vmatpush1.bf16.msra.mxu1 %v2537_v30 }
 0x2b6   :  { %702 = vmatprep.subr.bf16.mxu1 %v2542_v31 }
 0x2b9   :  { %703 = vmatpush1.bf16.msra.mxu1 %v2540_v32 }
 0x2ba   :  { %704 = vmatprep.subr.bf16.mxu1 %v2545_v33 }
 0x2bd   :  { %705 = vmatpush1.bf16.msra.mxu1 %v2543_v34 }
 0x2be   :  { %706 = vmatprep.subr.bf16.mxu1 %v2548_v35 }
 0x2c1   :  { %707 = vmatpush1.bf16.msra.mxu1 %v2546_v36 }
 0x2c2   :  { %2372 = vmatprep.subr.bf16.mxu1 %v2808_v0 }
 0x2c4   :  { %725 = vmatmul.mubr.bf16.vlgmr.msra.gmra.mrb[4].mxu1 %v442_v22 }
 0x2c5   :  { %2374 = vmatprep.mubr.msk.bf16.mxu1 %vm2814_vm0, %v2808_v0 }
 0x377   :  { %v685_v39 = vpop.f32.mrb[0].mxu1  ;;  %v767_v40 = vpop.f32.mrb[4].mxu0 }
 0x378   :  { %v773_v41 = vmul.f32 %v685_v39, %v142_v37  ;;  %v687_v42 = vpop.f32.mrb[1].mxu1  ;;  %v2370_v43 = vpop.f32.mrb[5].mxu0  ;;  %v3174_v60 = vpack.c.bf16 %v767_v40, %v767_v40 }
 0x379   :  { %v774_v44 = vmul.f32 %v2107_v38, %v687_v42  ;;  %v689_v45 = vpop.f32.mrb[2].mxu1  ;;  %v770_v46 = vpop.f32.mrb[6].mxu0  ;;  %v2549_v42 = vld [vmem:[#allocation9 + $0x10] sm:$0xff]  }
 0x37a   :  { %v690_v47 = vpop.f32.mrb[3].mxu1  ;;  %v2371_v48 = vpop.f32.mrb[7].mxu0  ;;  %v853_v62 = vsel %vm851_vm2, %v3174_v60, 0  ;;  %v2551_v46 = vld [vmem:[#allocation9] sm:$0xff]  }
 0x37b   :  { %v775_v49 = vadd.f32 %v774_v44, %v773_v41  ;;  %v2550_v44 = vld [vmem:[#allocation9 + $0x18] sm:$0xff]  }
 0x37d   :  { %v3176_v61 = vpack.c.bf16 %v775_v49, %v775_v49 }
 0x397   :  { %v726_v50 = vpop.f32.mrb[4].mxu1 }
 0x398   :  { %v776_v52 = vmul.f32 %v726_v50, %v142_v37  ;;  %v728_v53 = vpop.f32.mrb[5].mxu1 }
 0x399   :  { %v777_v54 = vmul.f32 %v2107_v38, %v728_v53  ;;  %v730_v55 = vpop.f32.mrb[6].mxu1 }
 0x39a   :  { %v731_v56 = vpop.f32.mrb[7].mxu1 }
 0x39b   :  { %v778_v57 = vadd.f32 %v777_v54, %v776_v52  ;;  %v2552_v52 = vld [vmem:[#allocation9 + $0x8] sm:$0xff]  }
 0x39d   :  { %v3169_v58 = vpack.c.bf16 %v778_v57, %v778_v57 }
 0x39f   :  { %v792_v59 = vsel %vm787_vm1, %v3169_v58, 0 }
 0x3a0   :  { %2373 = vmatpush3.bf16.xpose.msra.mxu1 %v792_v59 }
 0x3a1   :  { %2378 = vmatprep.subr.bf16.mxu1 %v2808_v0 }
 0x3a7   :  { %2375 = vmatmul.mubr.msk.bf16.vlgmr.msra.gmra.mrb[8].mxu1 %vm787_vm1, %v3176_v61 }
 0x3a8   :  { %2379 = vmatpush3.bf16.msra.mxu1 %v853_v62  ;;  %2380 = vmatprep.mubr.msk.bf16.mxu1 %vm2814_vm0, %v2808_v0 }
 0x3a9   :  { %2384 = vmatprep.subr.bf16.mxu1 %v2808_v0 }
 0x47a   :  { %v828_v1 = vpop.f32.mrb[8].mxu1 }
 0x47b   :  { %v834_v2 = vsel %vm786_vm3, %v828_v1, -1e+30  ;;  %v2376_v4 = vpop.f32.mrb[9].mxu1 }
 0x47c   :  { %v831_v5 = vpop.f32.mrb[10].mxu1  ;;  %v836_v6 = vsel %vm835_vm4, %v834_v2, -inf }
 0x47d   :  { %837 = vmax.xlane.f32.xlu1 %v836_v6  ;;  %v2377_v7 = vpop.f32.mrb[11].mxu1 }
 0x48e   :  { %904 = vrot.lane.b32.xlu1 %v3169_v58, %s2816_s2 }
 0x50a   :  { %v838_v15 = vpop.xlane.xlu1 %837 }
 0x50b   :  { %v839_v8 = vsub.f32 %v834_v2, %v838_v15 }
 0x50d   :  { %v840_v9 = vmul.f32 1.442695, %v839_v8 }
 0x50e   :  { %v905_v16 = vpop.permute.xlu1 %904 }
 0x50f   :  { %2627 = vpow2.f32 %v840_v9  ;;  %v910_v20 = vsel %vm787_vm1, %v905_v16, 0 }
 0x519   :  { %v2628_v10 = vpop.eup %2627 }
 0x51a   :  { %v842_v11 = vsel %vm835_vm4, %v2628_v10, 0.0 }
 0x51b   :  { %843 = vadd.xlane.f32.xlu0 %v842_v11 }
 0x531   :  { %901 = vrot.lane.b32.xlu0 %v3176_v61, %s2816_s2 }
 0x5a8   :  { %v844_v12 = vpop.xlane.xlu0 %843 }
 0x5a9   :  { %2629 = vrcp.f32 %v844_v12 }
 0x5ac   :  { %v902_v21 = vpop.permute.xlu0 %901 }
 0x5b3   :  { %v2630_v13 = vpop.eup %2629 }
 0x5b4   :  { %v846_v14 = vmul.f32 %v2630_v13, %v2628_v10 }
 0x5b6   :  { %v847_v18 = vpack.c.bf16 %v846_v14, %v846_v14 }
 0x5b8   :  { %2381 = vmatmul.mubr.msk.bf16.vlgmr.msra.gmra.mrb[12].mxu1 %vm835_vm4, %v847_v18 }
 0x5b9   :  { %2385 = vmatpush3.bf16.xpose.msra.mxu1 %v910_v20  ;;  %2386 = vmatprep.mubr.msk.bf16.mxu1 %vm2814_vm0, %v2808_v0 }
 0x5ba   :  { %2390 = vmatprep.subr.bf16.mxu1 %v2808_v0 }
 0x5c0   :  { %2387 = vmatmul.mubr.msk.bf16.vlgmr.msra.gmra.mrb[16].mxu1 %vm787_vm1, %v902_v21  ;;  %v2553_v21 = vld [vmem:[#allocation9 + $0x20] sm:$0xff]  }
 0x5c1   :  { %2392 = vmatprep.mubr.msk.bf16.mxu1 %vm2814_vm0, %v2808_v0  ;;  %2425 = vmatpush3.bf16.msra.mxu0 %v2553_v21 }
 0x5c2   :  { %2426 = vmatprep.subr.bf16.mxu0 %v2808_v0 }
 0x68b   :  { %v889_v22 = vpop.f32.mrb[12].mxu1 }
 0x68c   :  { %v2382_v23 = vpop.f32.mrb[13].mxu1  ;;  %v895_v53 = vpack.c.bf16 %v889_v22, %v889_v22 }
 0x68d   :  { %v892_v24 = vpop.f32.mrb[14].mxu1 }
 0x68e   :  { %v2383_v25 = vpop.f32.mrb[15].mxu1 }
 0x693   :  { %v946_v26 = vpop.f32.mrb[16].mxu1 }
 0x694   :  { %v952_v27 = vsel %vm786_vm3, %v946_v26, -1e+30  ;;  %v2388_v28 = vpop.f32.mrb[17].mxu1 }
 0x695   :  { %v949_v29 = vpop.f32.mrb[18].mxu1  ;;  %v953_v30 = vsel %vm835_vm4, %v952_v27, -inf }
 0x696   :  { %954 = vmax.xlane.f32.xlu1 %v953_v30  ;;  %v2389_v31 = vpop.f32.mrb[19].mxu1  ;;  %v2554_v29 = vld [vmem:[#allocation9 + $0x28] sm:$0xff]  }
 0x697   :  { %2427 = vmatpush3.bf16.msra.mxu0 %v2554_v29  ;;  %v2584_v29 = vld [vmem:[#allocation10 + $0x88] ss:$16 sps:$4 sm:$0xff]  }
 0x698   :  { %2438 = vmatprep.subr.bf16.mxu0 %v2808_v0 }
 0x6a7   :  { %966 = vrot.lane.b32.xlu1 %v3174_v60, %s2816_s2 }
 0x6ab   :  { %1129 = vrot.lane.b32.xlu1 %v3176_v61, %s2800_s29 }
 0x723   :  { %v955_v32 = vpop.xlane.xlu1 %954 }
 0x724   :  { %v956_v33 = vsub.f32 %v952_v27, %v955_v32 }
 0x726   :  { %v957_v34 = vmul.f32 1.442695, %v956_v33 }
 0x727   :  { %v967_v35 = vpop.permute.xlu1 %966 }
 0x728   :  { %2631 = vpow2.f32 %v957_v34  ;;  %v972_v36 = vsel %vm851_vm2, %v967_v35, 0 }
 0x729   :  { %2391 = vmatpush3.bf16.msra.mxu1 %v972_v36 }
 0x72a   :  { %2396 = vmatprep.subr.bf16.mxu1 %v2808_v0 }
 0x72b   :  { %v1130_v56 = vpop.permute.xlu1 %1129 }
 0x732   :  { %v2632_v37 = vpop.eup %2631 }
 0x733   :  { %v959_v38 = vsel %vm835_vm4, %v2632_v37, 0.0 }
 0x734   :  { %960 = vadd.xlane.f32.xlu0 %v959_v38 }
 0x74a   :  { %1131 = vrot.lane.b32.xlu0 %v3169_v58, %s2800_s29 }
 0x7c1   :  { %v961_v39 = vpop.xlane.xlu0 %960 }
 0x7c2   :  { %2633 = vrcp.f32 %v961_v39 }
 0x7c5   :  { %v1132_v54 = vpop.permute.xlu0 %1131 }
 0x7c6   :  { %v1137_v55 = vsel %vm787_vm1, %v1132_v54, 0 }
 0x7cc   :  { %v2634_v40 = vpop.eup %2633 }
 0x7cd   :  { %v963_v41 = vmul.f32 %v2634_v40, %v2632_v37 }
 0x7cf   :  { %v964_v43 = vpack.c.bf16 %v963_v41, %v963_v41 }
 0x7d1   :  { %2393 = vmatmul.mubr.msk.bf16.vlgmr.msra.gmra.mrb[20].mxu1 %vm835_vm4, %v964_v43 }
 0x7d2   :  { %2397 = vmatpush3.bf16.msra.mxu1 %v2549_v42  ;;  %2400 = vmatprep.mubr.msk.bf16.mxu1 %vm2814_vm0, %v2808_v0 }
 0x7d3   :  { %2398 = vmatprep.subr.bf16.mxu1 %v2808_v0 }
 0x7d6   :  { %2399 = vmatpush3.bf16.msra.mxu1 %v2550_v44 }
 0x7d7   :  { %2404 = vmatprep.subr.bf16.mxu1 %v2808_v0 }
 0x8a4   :  { %v1008_v45 = vpop.f32.mrb[20].mxu1 }
 0x8a5   :  { %v1014_v47 = vpack.c.bf16 %v1008_v45, %v1008_v45  ;;  %v2394_v48 = vpop.f32.mrb[21].mxu1 }
 0x8a6   :  { %v1011_v49 = vpop.f32.mrb[22].mxu1 }
 0x8a7   :  { %v2395_v50 = vpop.f32.mrb[23].mxu1  ;;  %2401 = vmatmul.mubr.msk.bf16.vlgmr.msra.gmra.mrb[24].mxu1 %vm787_vm1, %v1014_v47 }
 0x8a8   :  { %2405 = vmatpush3.bf16.msra.mxu1 %v2551_v46  ;;  %2408 = vmatprep.mubr.msk.bf16.mxu1 %vm2814_vm0, %v2808_v0  ;;  %v2555_v46 = vld [vmem:[#allocation9 + $0x30] sm:$0xff]  }
 0x8a9   :  { %2406 = vmatprep.subr.bf16.mxu1 %v2808_v0 }
 0x8ac   :  { %2407 = vmatpush3.bf16.msra.mxu1 %v2552_v52 }
 0x8ad   :  { %2412 = vmatprep.subr.bf16.mxu1 %v2808_v0 }
 0x8af   :  { %2409 = vmatmul.mubr.msk.bf16.vlgmr.msra.gmra.mrb[28].mxu1 %vm787_vm1, %v895_v53 }
 0x8b0   :  { %2414 = vmatprep.mubr.msk.bf16.mxu1 %vm2814_vm0, %v2808_v0 }
 0x8b5   :  { %2413 = vmatpush3.bf16.xpose.msra.mxu1 %v1137_v55 }
 0x8b6   :  { %2418 = vmatprep.subr.bf16.mxu1 %v2808_v0 }
 0x8bc   :  { %2415 = vmatmul.mubr.msk.bf16.vlgmr.msra.gmra.mrb[32].mxu1 %vm787_vm1, %v1130_v56 }
 0x8bd   :  { %2420 = vmatprep.mubr.msk.bf16.mxu1 %vm2814_vm0, %v2808_v0 }
 0x97a   :  { %v1068_v57 = vpop.f32.mrb[24].mxu1 }
 0x97b   :  { %v2402_v59 = vpop.f32.mrb[25].mxu1 }
 0x97c   :  { %v1071_v62 = vpop.f32.mrb[26].mxu1 }
 0x97d   :  { %v2403_v1 = vpop.f32.mrb[27].mxu1 }
 0x982   :  { %v1123_v2 = vpop.f32.mrb[28].mxu1 }
 0x983   :  { %v3238_v4 = vadd.f32 %v1123_v2, %v1068_v57  ;;  %v2410_v5 = vpop.f32.mrb[29].mxu1 }
 0x984   :  { %v1126_v6 = vpop.f32.mrb[30].mxu1  ;;  %v2559_v5 = vld [vmem:[#allocation10 + $0x4] ss:$16 sps:$4 sm:$0xff]  }
 0x985   :  { %v2411_v7 = vpop.f32.mrb[31].mxu1  ;;  %v2560_v6 = vld [vmem:[#allocation10 + $0x8] ss:$16 sps:$4 sm:$0xff]  }
 0x986   :  { %v2562_v7 = vld [vmem:[#allocation10 + $0xc] ss:$16 sps:$4 sm:$0xff]  }
 0x98f   :  { %v1173_v15 = vpop.f32.mrb[32].mxu1 }
 0x990   :  { %v1179_v8 = vsel %vm786_vm3, %v1173_v15, -1e+30  ;;  %v2416_v9 = vpop.f32.mrb[33].mxu1  ;;  %v2565_v15 = vld [vmem:[#allocation10 + $0x24] ss:$16 sps:$4 sm:$0xff]  }
 0x991   :  { %v1176_v10 = vpop.f32.mrb[34].mxu1  ;;  %v1180_v11 = vsel %vm835_vm4, %v1179_v8, -inf  ;;  %v2563_v9 = vld [vmem:[#allocation10 + $0x20] ss:$16 sps:$4 sm:$0xff]  }
 0x992   :  { %1181 = vmax.xlane.f32.xlu1 %v1180_v11  ;;  %v2417_v12 = vpop.f32.mrb[35].mxu1  ;;  %v2566_v10 = vld [vmem:[#allocation10 + $0x28] ss:$16 sps:$4 sm:$0xff]   ;;  %v2571_v11 = vld [vmem:[#allocation10 + $0x44] ss:$16 sps:$4 sm:$0xff]  }
 0x993   :  { %v2574_v12 = vld [vmem:[#allocation10 + $0x4c] ss:$16 sps:$4 sm:$0xff]  }
 0x9a3   :  { %1303 = vrot.lane.b32.xlu1 %v3169_v58, %s2817_s6 }
 0x9a7   :  { %1301 = vrot.lane.b32.xlu1 %v3176_v61, %s2817_s6 }
 0xa1f   :  { %v1182_v13 = vpop.xlane.xlu1 %1181 }
 0xa20   :  { %v1183_v14 = vsub.f32 %v1179_v8, %v1182_v13  ;;  %v2568_v8 = vld [vmem:[#allocation10 + $0x2c] ss:$16 sps:$4 sm:$0xff]   ;;  %v2569_v13 = vld [vmem:[#allocation10 + $0x40] ss:$16 sps:$4 sm:$0xff]  }
 0xa22   :  { %v1184_v16 = vmul.f32 1.442695, %v1183_v14  ;;  %v2572_v14 = vld [vmem:[#allocation10 + $0x48] ss:$16 sps:$4 sm:$0xff]  }
 0xa23   :  { %v1304_v25 = vpop.permute.xlu1 %1303 }
 0xa24   :  { %2635 = vpow2.f32 %v1184_v16  ;;  %v1309_v27 = vsel %vm787_vm1, %v1304_v25, 0  ;;  %v2575_v25 = vld [vmem:[#allocation10 + $0x60] ss:$16 sps:$4 sm:$0xff]  }
 0xa27   :  { %v1302_v28 = vpop.permute.xlu1 %1301 }
 0xa2e   :  { %v2636_v18 = vpop.eup %2635 }
 0xa2f   :  { %v1186_v20 = vsel %vm835_vm4, %v2636_v18, 0.0 }
 0xa30   :  { %1187 = vadd.xlane.f32.xlu0 %v1186_v20 }
 0xa46   :  { %1192 = vrot.lane.b32.xlu0 %v3174_v60, %s2800_s29 }
 0xabd   :  { %v1188_v22 = vpop.xlane.xlu0 %1187 }
 0xabe   :  { %2637 = vrcp.f32 %v1188_v22 }
 0xac1   :  { %v1193_v58 = vpop.permute.xlu0 %1192 }
 0xac2   :  { %v1198_v61 = vsel %vm851_vm2, %v1193_v58, 0 }
 0xac3   :  { %2419 = vmatpush3.bf16.msra.mxu1 %v1198_v61 }
 0xac4   :  { %2432 = vmatprep.subr.bf16.mxu1 %v2808_v0 }
 0xac8   :  { %v2638_v23 = vpop.eup %2637 }
 0xac9   :  { %v1190_v24 = vmul.f32 %v2638_v23, %v2636_v18  ;;  %v2577_v23 = vld [vmem:[#allocation10 + $0x64] ss:$16 sps:$4 sm:$0xff]  }
 0xacb   :  { %v1191_v26 = vpack.c.bf16 %v1190_v24, %v1190_v24  ;;  %v2580_v24 = vld [vmem:[#allocation10 + $0x6c] ss:$16 sps:$4 sm:$0xff]  }
 0xacd   :  { %2421 = vmatmul.mubr.msk.bf16.vlgmr.msra.gmra.mrb[36].mxu1 %vm835_vm4, %v1191_v26  ;;  %v2578_v26 = vld [vmem:[#allocation10 + $0x68] ss:$16 sps:$4 sm:$0xff]  }
 0xace   :  { %2433 = vmatpush3.bf16.xpose.msra.mxu1 %v1309_v27  ;;  %2434 = vmatprep.mubr.msk.bf16.mxu1 %vm2814_vm0, %v2808_v0  ;;  %v2581_v27 = vld [vmem:[#allocation10 + $0x80] ss:$16 sps:$4 sm:$0xff]  }
 0xacf   :  { %2444 = vmatprep.subr.bf16.mxu1 %v2808_v0 }
 0xad5   :  { %2435 = vmatmul.mubr.msk.bf16.vlgmr.msra.gmra.mrb[40].mxu1 %vm787_vm1, %v1302_v28  ;;  %v2583_v28 = vld [vmem:[#allocation10 + $0x84] ss:$16 sps:$4 sm:$0xff]  }
 0xad6   :  { %2448 = vmatprep.mubr.msk.bf16.mxu1 %vm2814_vm0, %v2808_v0  ;;  %2445 = vmatpush3.bf16.msra.mxu1 %v2555_v46 }
 0xad7   :  { %2446 = vmatprep.subr.bf16.mxu1 %v2808_v0 }
 0xba0   :  { %v1234_v30 = vpop.f32.mrb[36].mxu1 }
 0xba1   :  { %v1240_v31 = vpack.c.bf16 %v1234_v30, %v1234_v30  ;;  %v2422_v32 = vpop.f32.mrb[37].mxu1  ;;  %v2586_v30 = vld [vmem:[#allocation10 + $0x8c] ss:$16 sps:$4 sm:$0xff]  }
 0xba2   :  { %v1237_v33 = vpop.f32.mrb[38].mxu1  ;;  %v2587_v32 = vld [vmem:[#allocation10 + $0xa0] ss:$16 sps:$4 sm:$0xff]  }
 0xba3   :  { %v2423_v34 = vpop.f32.mrb[39].mxu1  ;;  %2429 = vmatmul.mubr.msk.bf16.vlgmr.msra.gmra.mrb[8].mxu0 %vm787_vm1, %v1240_v31  ;;  %v2589_v31 = vld [vmem:[#allocation10 + $0xa4] ss:$16 sps:$4 sm:$0xff]   ;;  %v2590_v33 = vld [vmem:[#allocation10 + $0xa8] ss:$16 sps:$4 sm:$0xff]  }
 0xba4   :  { %2440 = vmatprep.mubr.msk.bf16.mxu0 %vm2814_vm0, %v2808_v0  ;;  %v2556_v0 = vld [vmem:[#allocation9 + $0x38] sm:$0xff]   ;;  %v2595_v34 = vld [vmem:[#allocation10 + $0xc4] ss:$16 sps:$4 sm:$0xff]  }
 0xba5   :  { %2447 = vmatpush3.bf16.msra.mxu1 %v2556_v0  ;;  %v2613_v0 = vld [vmem:[#allocation12 + $0x60] sm:$0xff]  }
 0xba6   :  { %1720 = vmatprep.subr.bf16.mxu1 %v2562_v7 }
 0xba8   :  { %v1345_v35 = vpop.f32.mrb[40].mxu1 }
 0xba9   :  { %v1351_v36 = vsel %vm786_vm3, %v1345_v35, -1e+30  ;;  %v2436_v37 = vpop.f32.mrb[41].mxu1  ;;  %v2598_v35 = vld [vmem:[#allocation10 + $0xcc] ss:$16 sps:$4 sm:$0xff]  }
 0xbaa   :  { %v1348_v38 = vpop.f32.mrb[42].mxu1  ;;  %v1352_v39 = vsel %vm835_vm4, %v1351_v36, -inf  ;;  %v2596_v37 = vld [vmem:[#allocation10 + $0xc8] ss:$16 sps:$4 sm:$0xff]  }
 0xbab   :  { %1353 = vmax.xlane.f32.xlu1 %v1352_v39  ;;  %v2437_v40 = vpop.f32.mrb[43].mxu1  ;;  %v2601_v38 = vld [vmem:[#allocation10 + $0xe4] ss:$16 sps:$4 sm:$0xff]   ;;  %v2604_v39 = vld [vmem:[#allocation10 + $0xec] ss:$16 sps:$4 sm:$0xff]  }
 0xbac   :  { %v2599_v40 = vld [vmem:[#allocation10 + $0xe0] ss:$16 sps:$4 sm:$0xff]  }
 0xc38   :  { %v1354_v41 = vpop.xlane.xlu1 %1353 }
 0xc39   :  { %v1355_v42 = vsub.f32 %v1351_v36, %v1354_v41  ;;  %v2593_v36 = vld [vmem:[#allocation10 + $0xc0] ss:$16 sps:$4 sm:$0xff]   ;;  %v2602_v41 = vld [vmem:[#allocation10 + $0xe8] ss:$16 sps:$4 sm:$0xff]  }
 0xc3b   :  { %v1356_v43 = vmul.f32 1.442695, %v1355_v42 }
 0xc3d   :  { %2639 = vpow2.f32 %v1356_v43 }
 0xc47   :  { %v2640_v44 = vpop.eup %2639 }
 0xc48   :  { %v1358_v45 = vsel %vm835_vm4, %v2640_v44, 0.0 }
 0xc49   :  { %1359 = vadd.xlane.f32.xlu0 %v1358_v45  ;;  %v1483_v45 = vsub.s32 3, %v2997_v17 }
 0xc4b   :  { %v1484_v46 = vrot.slane %v3003_v19, %v1483_v45  ;;  %v2611_v19 = vld [vmem:[#allocation12 + $0x58] sm:$0xff]  }
 0xc5f   :  { %1364 = vrot.lane.b32.xlu0 %v3174_v60, %s2817_s6 }
 0xc76   :  { %v1294_v63 = vpop.f32.mrb[8].mxu0 }
 0xc77   :  { %v1300_v47 = vadd.f32 %v1294_v63, %v3238_v4  ;;  %v2430_v48 = vpop.f32.mrb[9].mxu0  ;;  %v2557_v4 = vld [vmem:[#allocation10] ss:$16 sps:$4 sm:$0xff]  }
 0xc78   :  { %v1297_v49 = vpop.f32.mrb[10].mxu0 }
 0xc79   :  { %v2431_v50 = vpop.f32.mrb[11].mxu0 }
 0xc7a   :  { %v2605_v50 = vld [vmem:[#allocation12 + $0x40] sm:$0xff]  }
 0xcd6   :  { %v1360_v52 = vpop.xlane.xlu0 %1359 }
 0xcd7   :  { %2641 = vrcp.f32 %v1360_v52  ;;  %v2606_v52 = vld [vmem:[#allocation12] sm:$0xff]  }
 0xcda   :  { %v1365_v53 = vpop.permute.xlu0 %1364 }
 0xcdb   :  { %v1370_v54 = vsel %vm851_vm2, %v1365_v53, 0  ;;  %v2607_v53 = vld [vmem:[#allocation12 + $0x48] sm:$0xff]  }
 0xcdc   :  { %2439 = vmatpush3.bf16.msra.mxu0 %v1370_v54  ;;  %v2608_v54 = vld [vmem:[#allocation12 + $0x8] sm:$0xff]  }
 0xcdd   :  { %1679 = vmatprep.subr.bf16.mxu0 %v2559_v5  ;;  %v2620_v5 = vld [vmem:[#allocation12 + $0x38] sm:$0xff]  }
 0xce1   :  { %v2642_v55 = vpop.eup %2641 }
 0xce2   :  { %v1362_v56 = vmul.f32 %v2642_v55, %v2640_v44  ;;  %v2609_v55 = vld [vmem:[#allocation12 + $0x50] sm:$0xff]  }
 0xce4   :  { %v1363_v57 = vpack.c.bf16 %v1362_v56, %v1362_v56  ;;  %v2610_v56 = vld [vmem:[#allocation12 + $0x10] sm:$0xff]  }
 0xce6   :  { %2441 = vmatmul.mubr.msk.bf16.vlgmr.msra.gmra.mrb[12].mxu0 %vm835_vm4, %v1363_v57  ;;  %v2612_v57 = vld [vmem:[#allocation12 + $0x18] sm:$0xff]  }
 0xce7   :  { %1711 = vmatprep.mubr.bf16.mxu0 %v2815_v3  ;;  %1680 = vmatpush1.bf16.msra.mxu0 %v2557_v4  ;;  %v2619_v4 = vld [vmem:[#allocation12 + $0x78] sm:$0xff]  }
 0xce8   :  { %1681 = vmatprep.subr.bf16.mxu0 %v2565_v15 }
 0xceb   :  { %1682 = vmatpush1.bf16.msra.mxu0 %v2563_v9 }
 0xcec   :  { %1683 = vmatprep.subr.bf16.mxu0 %v2571_v11 }
 0xcef   :  { %1684 = vmatpush1.bf16.msra.mxu0 %v2569_v13 }
 0xcf0   :  { %1685 = vmatprep.subr.bf16.mxu0 %v2577_v23 }
 0xcf3   :  { %1686 = vmatpush1.bf16.msra.mxu0 %v2575_v25 }
 0xcf4   :  { %1687 = vmatprep.subr.bf16.mxu0 %v2583_v28 }
 0xcf7   :  { %1688 = vmatpush1.bf16.msra.mxu0 %v2581_v27 }
 0xcf8   :  { %1689 = vmatprep.subr.bf16.mxu0 %v2589_v31 }
 0xcfb   :  { %1690 = vmatpush1.bf16.msra.mxu0 %v2587_v32 }
 0xcfc   :  { %1691 = vmatprep.subr.bf16.mxu0 %v2595_v34 }
 0xcff   :  { %1692 = vmatpush1.bf16.msra.mxu0 %v2593_v36 }
 0xd00   :  { %1693 = vmatprep.subr.bf16.mxu0 %v2601_v38  ;;  %v1956_v38 = vsub.s32 4, %v2997_v17 }
 0xd03   :  { %1694 = vmatpush1.bf16.msra.mxu0 %v2599_v40 }
 0xd04   :  { %2290 = vmatprep.subr.bf16.mxu0 %v2605_v50 }
 0xdb9   :  { %v1406_v60 = vpop.f32.mrb[12].mxu0 }
 0xdba   :  { %v1412_v59 = vpack.c.bf16 %v1406_v60, %v1406_v60  ;;  %v2442_v62 = vpop.f32.mrb[13].mxu0  ;;  %v2614_v60 = vld [vmem:[#allocation12 + $0x20] sm:$0xff]  }
 0xdbb   :  { %v1409_v1 = vpop.f32.mrb[14].mxu0  ;;  %v2616_v62 = vld [vmem:[#allocation12 + $0x28] sm:$0xff]  }
 0xdbc   :  { %v2443_v2 = vpop.f32.mrb[15].mxu0  ;;  %2449 = vmatmul.mubr.msk.bf16.vlgmr.msra.gmra.mrb[44].mxu1 %vm787_vm1, %v1412_v59  ;;  %v2615_v59 = vld [vmem:[#allocation12 + $0x68] sm:$0xff]   ;;  %v2617_v1 = vld [vmem:[#allocation12 + $0x70] sm:$0xff]  }
 0xdbd   :  { %1752 = vmatprep.mubr.bf16.mxu1 %v2815_v3  ;;  %1721 = vmatpush1.bf16.msra.mxu1 %v2560_v6  ;;  %v2618_v2 = vld [vmem:[#allocation12 + $0x30] sm:$0xff]  }
 0xdbe   :  { %1722 = vmatprep.subr.bf16.mxu1 %v2568_v8 }
 0xdc1   :  { %1723 = vmatpush1.bf16.msra.mxu1 %v2566_v10 }
 0xdc2   :  { %1724 = vmatprep.subr.bf16.mxu1 %v2574_v12 }
 0xdc5   :  { %1725 = vmatpush1.bf16.msra.mxu1 %v2572_v14 }
 0xdc6   :  { %1726 = vmatprep.subr.bf16.mxu1 %v2580_v24 }
 0xdc9   :  { %1727 = vmatpush1.bf16.msra.mxu1 %v2578_v26 }
 0xdca   :  { %1728 = vmatprep.subr.bf16.mxu1 %v2586_v30 }
 0xdcd   :  { %1729 = vmatpush1.bf16.msra.mxu1 %v2584_v29 }
 0xe8f   :  { %v1466_v16 = vpop.f32.mrb[44].mxu1 }
 0xe90   :  { %v1472_v18 = vadd.f32 %v1466_v16, %v1300_v47  ;;  %v2450_v20 = vpop.f32.mrb[45].mxu1 }
 0xe91   :  { %v1469_v21 = vpop.f32.mrb[46].mxu1 }
 0xe92   :  { %v3281_v22 = vadd.f32 %v1472_v18, %v3051_v51  ;;  %v2451_v58 = vpop.f32.mrb[47].mxu1  ;;  %v2592_v51 = vld [vmem:[#allocation10 + $0xac] ss:$16 sps:$4 sm:$0xff]  }
 0xe93   :  { %1730 = vmatprep.subr.bf16.mxu1 %v2592_v51 }
 0xe94   :  { %v1474_v61 = vmul.f32 %v3281_v22, %v3281_v22  ;;  %1731 = vmatpush1.bf16.msra.mxu1 %v2590_v33 }
 0xe95   :  { %1732 = vmatprep.subr.bf16.mxu1 %v2598_v35 }
 0xe96   :  { %1475 = vadd.xlane.f32.xlu1 %v1474_v61 }
 0xe98   :  { %1733 = vmatpush1.bf16.msra.mxu1 %v2596_v37 }
 0xe99   :  { %1734 = vmatprep.subr.bf16.mxu1 %v2604_v39  ;;  %v2655_v39 = vld [vmem:[%s3314_s3] sm:$0xff] }
 0xe9a   :  { %v1957_v40 = vrot.slane %v2655_v39, %v1956_v38 }
 0xe9c   :  { %1735 = vmatpush1.bf16.msra.mxu1 %v2602_v41 }
 0xf23   :  { %v1476_v42 = vpop.xlane.xlu1 %1475 }
 0xf24   :  { %v1477_v43 = vmul.f32 0.0078125, %v1476_v42 }
 0xf26   :  { %v1478_v44 = vadd.f32 1e-06, %v1477_v43 }
 0xf28   :  { %2643 = vrsqrt.f32 %v1478_v44 }
 0xf32   :  { %v2644_v63 = vpop.eup %2643 }
 0xf33   :  { %v1480_v47 = vmul.f32 %v2644_v63, %v3281_v22 }
 0xf35   :  { %v1485_v48 = vmul.f32 %v1484_v46, %v1480_v47 }
 0xf37   :  { %v1518_v49 = vpack.c.bf16 %v1485_v48, %v1485_v48 }
 0xf39   :  { %1712 = vmatmul.mubr.bf16.vlgmr.msra.gmra.mrb[16].mxu0 %v1518_v49  ;;  %1753 = vmatmul.mubr.bf16.vlgmr.msra.gmra.mrb[48].mxu1 %v1518_v49 }
 0xf3a   :  { %2291 = vmatpush3.bf16.msra.mxu0 %v2606_v52 }
 0xf3b   :  { %2292 = vmatprep.subr.bf16.mxu0 %v2607_v53 }
 0xf3e   :  { %2293 = vmatpush3.bf16.msra.mxu0 %v2608_v54 }
 0xf3f   :  { %2294 = vmatprep.subr.bf16.mxu0 %v2609_v55 }
 0xf42   :  { %2295 = vmatpush3.bf16.msra.mxu0 %v2610_v56 }
 0xf43   :  { %2296 = vmatprep.subr.bf16.mxu0 %v2611_v19 }
 0xf46   :  { %2297 = vmatpush3.bf16.msra.mxu0 %v2612_v57 }
 0xf47   :  { %2298 = vmatprep.subr.bf16.mxu0 %v2613_v0 }
 0xf4a   :  { %2299 = vmatpush3.bf16.msra.mxu0 %v2614_v60 }
 0xf4b   :  { %2300 = vmatprep.subr.bf16.mxu0 %v2615_v59 }
 0xf4e   :  { %2301 = vmatpush3.bf16.msra.mxu0 %v2616_v62 }
 0xf4f   :  { %2302 = vmatprep.subr.bf16.mxu0 %v2617_v1 }
 0xf52   :  { %2303 = vmatpush3.bf16.msra.mxu0 %v2618_v2 }
 0xf53   :  { %2304 = vmatprep.subr.bf16.mxu0 %v2619_v4 }
 0xf56   :  { %2305 = vmatpush3.bf16.msra.mxu0 %v2620_v5 }
0x100c   :  { %v1713_v6 = vpop.f32.mrb[16].mxu0  ;;  %v1754_v7 = vpop.f32.mrb[48].mxu1 }
0x100d   :  { %v2216_v15 = vmul.f32 -1.442695, %v1713_v6  ;;  %v1715_v8 = vpop.f32.mrb[17].mxu0  ;;  %v1756_v9 = vpop.f32.mrb[49].mxu1 }
0x100e   :  { %v2217_v10 = vmul.f32 -1.442695, %v1715_v8  ;;  %v1717_v11 = vpop.f32.mrb[18].mxu0  ;;  %v1758_v12 = vpop.f32.mrb[50].mxu1 }
0x100f   :  { %2645 = vpow2.f32 %v2216_v15  ;;  %v1718_v13 = vpop.f32.mrb[19].mxu0  ;;  %v1759_v14 = vpop.f32.mrb[51].mxu1 }
0x1010   :  { %2647 = vpow2.f32 %v2217_v10 }
0x1019   :  { %v2646_v16 = vpop.eup %2645 }
0x101a   :  { %v2648_v18 = vpop.eup %2647  ;;  %v1767_v20 = vadd.f32 1.0, %v2646_v16 }
0x101b   :  { %v1768_v21 = vadd.f32 1.0, %v2648_v18 }
0x101c   :  { %2649 = vrcp.f32 %v1767_v20 }
0x101d   :  { %2651 = vrcp.f32 %v1768_v21 }
0x1026   :  { %v2650_v58 = vpop.eup %2649 }
0x1027   :  { %v2652_v61 = vpop.eup %2651  ;;  %v1773_v23 = vmul.f32 %v2650_v58, %v1713_v6 }
0x1028   :  { %v1774_v24 = vmul.f32 %v2652_v61, %v1715_v8 }
0x1029   :  { %v1775_v25 = vmul.f32 %v1773_v23, %v1754_v7 }
0x102a   :  { %v1776_v26 = vmul.f32 %v1774_v24, %v1756_v9 }
0x102b   :  { %v1809_v28 = vpack.c.bf16 %v1775_v25, %v1775_v25 }
0x102c   :  { %v1810_v27 = vpack.c.bf16 %v1776_v26, %v1776_v26 }
0x102e   :  { %1939 = vmatprep.mubr.bf16.mxu0 %v1810_v27 }
0x102f   :  { %1940 = vmatmul.mubr.bf16.vlgmr.msra.gmra.mrb[20].mxu0 %v1809_v28 }
0x1102   :  { %v2306_v29 = vpop.f32.mrb[20].mxu0 }
0x1103   :  { %v2307_v30 = vpop.f32.mrb[21].mxu0 }
0x1104   :  { %v2308_v31 = vadd.f32 %v2307_v30, %v2306_v29  ;;  %v2309_v51 = vpop.f32.mrb[22].mxu0 }
0x1105   :  { %v2310_v32 = vpop.f32.mrb[23].mxu0 }
0x1106   :  { %v1942_v33 = vadd.f32 %v2308_v31, %v3281_v22 }
0x1108   :  { %v1947_v34 = vmul.f32 %v1942_v33, %v1942_v33 }
0x110a   :  { %1948 = vadd.xlane.f32.xlu1 %v1947_v34 }
0x1197   :  { %v1949_v35 = vpop.xlane.xlu1 %1948 }
0x1198   :  { %v1950_v36 = vmul.f32 0.0078125, %v1949_v35 }
0x119a   :  { %v1951_v37 = vadd.f32 1e-06, %v1950_v36 }
0x119c   :  { %2653 = vrsqrt.f32 %v1951_v37 }
0x11a6   :  { %v2654_v41 = vpop.eup %2653 }
0x11a7   :  { %v1953_v42 = vmul.f32 %v2654_v41, %v1942_v33 }
0x11a9   :  { %v3293_v43 = vmul.f32 %v1957_v40, %v1953_v42 }
0x11aa   :  { %2794 = dma.done.wait [#allocation3], 4096 }
0x11ab   :  { %2795 = vsyncadd [#allocation3], 4294963200  ;;  %2028 = vmatprep.mubr.bf16.mxu1 %v2815_v3  ;;  %2069 = vmatprep.mubr.bf16.mxu0 %v2815_v3  ;;  %v1964_v22 = vld [vmem:[#allocation2 + $0x8] sm:$0xff]  ;;  %v1966_v44 = vld [vmem:[#allocation2 + $0x18] sm:$0xff]  ;;  %v1995_v11 = vpack.c.bf16 %v3293_v43, %v3293_v43  ;;  %s2818_s3 = smov [#allocation13]  }
0x11ac   :  { %v1963_v45 = vld [vmem:[#allocation2] sm:$0xff]  ;;  %1996 = vmatprep.subr.bf16.mxu1 %v1964_v22  ;;  %2037 = vmatprep.subr.bf16.mxu0 %v1966_v44  ;;  %v1965_v17 = vld [vmem:[#allocation2 + $0x10] sm:$0xff]  ;;  %v1968_v46 = vld [vmem:[#allocation2 + $0x28] sm:$0xff]  ;;  %s2088_s12 = sshll.u32 %s2818_s3, 4  ;;  %s2089_s12 = int_to_ptr.vmem [resolvable:$true] %s2088_s12 }
0x11ad   :  { %v1970_v63 = vld [vmem:[#allocation2 + $0x38] sm:$0xff]  ;;  %1997 = vmatpush1.bf16.msra.mxu1 %v1963_v45  ;;  %2038 = vmatpush1.bf16.msra.mxu0 %v1965_v17  ;;  %v1967_v47 = vld [vmem:[#allocation2 + $0x20] sm:$0xff]  ;;  %v1969_v48 = vld [vmem:[#allocation2 + $0x30] sm:$0xff]  ;;  %s2766_s24 = scalar_lea.vmem %s2089_s12, 512  ;;  %p2771_p13 = scmp.lt.s32.totalorder %s2089_s12, %s2089_s12 }
0x11ae   :  { %1998 = vmatprep.subr.bf16.mxu1 %v1968_v46  ;;  %2039 = vmatprep.subr.bf16.mxu0 %v1970_v63  ;;  %v1972_v49 = vld [vmem:[#allocation2 + $0x48] sm:$0xff]  ;;  %v1974_v50 = vld [vmem:[#allocation2 + $0x58] sm:$0xff]  ;;  %v1971_v3 = vld [vmem:[#allocation2 + $0x40] sm:$0xff]  ;;  %p2767_p12 = scmp.ne.s32.totalorder %s2089_s12, %s2766_s24  ;;  %p2772_p0 = scmp.lt.s32.totalorder %s2766_s24, %s2766_s24 }
0x11af   :  { %v1973_v52 = vld [vmem:[#allocation2 + $0x50] sm:$0xff]  ;;  %v1976_v53 = vld [vmem:[#allocation2 + $0x68] sm:$0xff]  ;;  %v1978_v54 = vld [vmem:[#allocation2 + $0x78] sm:$0xff] }
0x11b0   :  { %v1975_v55 = vld [vmem:[#allocation2 + $0x60] sm:$0xff]  ;;  %v1977_v56 = vld [vmem:[#allocation2 + $0x70] sm:$0xff]  ;;  %v1980_v19 = vld [vmem:[#allocation2 + $0x88] sm:$0xff]  ;;  %p2773_p1 = por %p2772_p0, %p2771_p13 }
0x11b1   :  { %1999 = vmatpush1.bf16.msra.mxu1 %v1967_v47  ;;  %2040 = vmatpush1.bf16.msra.mxu0 %v1969_v48  ;;  %v1982_v57 = vld [vmem:[#allocation2 + $0x98] sm:$0xff]  ;;  %v1979_v0 = vld [vmem:[#allocation2 + $0x80] sm:$0xff]  ;;  %v1981_v60 = vld [vmem:[#allocation2 + $0x90] sm:$0xff] }
0x11b2   :  { %2000 = vmatprep.subr.bf16.mxu1 %v1972_v49  ;;  %2041 = vmatprep.subr.bf16.mxu0 %v1974_v50  ;;  %v1984_v59 = vld [vmem:[#allocation2 + $0xa8] sm:$0xff]  ;;  %v1986_v62 = vld [vmem:[#allocation2 + $0xb8] sm:$0xff]  ;;  %v1983_v1 = vld [vmem:[#allocation2 + $0xa0] sm:$0xff]  ;;  %p2774_p2 = pnand %p2773_p1, %p2767_p12 }
0x11b3   :  { %v1985_v2 = vld [vmem:[#allocation2 + $0xb0] sm:$0xff]  ;;  %v1988_v4 = vld [vmem:[#allocation2 + $0xc8] sm:$0xff]  ;;  %v1990_v5 = vld [vmem:[#allocation2 + $0xd8] sm:$0xff] }
0x11b4   :  { %v1987_v6 = vld [vmem:[#allocation2 + $0xc0] sm:$0xff]  ;;  %v1989_v7 = vld [vmem:[#allocation2 + $0xd0] sm:$0xff]  ;;  %v1992_v15 = vld [vmem:[#allocation2 + $0xe8] sm:$0xff] }
0x11b5   :  { %2001 = vmatpush1.bf16.msra.mxu1 %v1971_v3  ;;  %2042 = vmatpush1.bf16.msra.mxu0 %v1973_v52  ;;  %v1994_v8 = vld [vmem:[#allocation2 + $0xf8] sm:$0xff]  ;;  %v1991_v9 = vld [vmem:[#allocation2 + $0xe0] sm:$0xff]  ;;  %v1993_v10 = vld [vmem:[#allocation2 + $0xf0] sm:$0xff] }
0x11b6   :  { %2002 = vmatprep.subr.bf16.mxu1 %v1976_v53  ;;  %2043 = vmatprep.subr.bf16.mxu0 %v1978_v54 }
0x11b9   :  { %2003 = vmatpush1.bf16.msra.mxu1 %v1975_v55  ;;  %2044 = vmatpush1.bf16.msra.mxu0 %v1977_v56 }
0x11ba   :  { %2004 = vmatprep.subr.bf16.mxu1 %v1980_v19  ;;  %2045 = vmatprep.subr.bf16.mxu0 %v1982_v57 }
0x11bd   :  { %2005 = vmatpush1.bf16.msra.mxu1 %v1979_v0  ;;  %2046 = vmatpush1.bf16.msra.mxu0 %v1981_v60 }
0x11be   :  { %2006 = vmatprep.subr.bf16.mxu1 %v1984_v59  ;;  %2047 = vmatprep.subr.bf16.mxu0 %v1986_v62 }
0x11c1   :  { %2007 = vmatpush1.bf16.msra.mxu1 %v1983_v1  ;;  %2048 = vmatpush1.bf16.msra.mxu0 %v1985_v2 }
0x11c2   :  { %2008 = vmatprep.subr.bf16.mxu1 %v1988_v4  ;;  %2049 = vmatprep.subr.bf16.mxu0 %v1990_v5 }
0x11c5   :  { %2009 = vmatpush1.bf16.msra.mxu1 %v1987_v6  ;;  %2050 = vmatpush1.bf16.msra.mxu0 %v1989_v7 }
0x11c6   :  { %2010 = vmatprep.subr.bf16.mxu1 %v1992_v15  ;;  %2051 = vmatprep.subr.bf16.mxu0 %v1994_v8 }
0x11c9   :  { %2011 = vmatpush1.bf16.msra.mxu1 %v1991_v9  ;;  %2052 = vmatpush1.bf16.msra.mxu0 %v1993_v10 }
0x11cc   :  { %2029 = vmatmul.mubr.bf16.vlgmr.msra.gmra.mrb[52].mxu1 %v1995_v11  ;;  %2070 = vmatmul.mubr.bf16.vlgmr.msra.gmra.mrb[24].mxu0 %v1995_v11 }
0x129f   :  { %v2030_v12 = vpop.f32.mrb[52].mxu1  ;;  %v2071_v13 = vpop.f32.mrb[24].mxu0 }
0x12a0   :  { %2078 = vst [vmem:[#allocation13] sm:$0xff] %v2030_v12  ;;  %2080 = vst [vmem:[#allocation13 + $0x10] sm:$0xff] %v2071_v13  ;;  %v2032_v14 = vpop.f32.mrb[53].mxu1  ;;  %v2073_v16 = vpop.f32.mrb[25].mxu0 }
0x12a1   :  { %2079 = vst [vmem:[#allocation13 + $0x8] sm:$0xff] %v2032_v14  ;;  %2081 = vst [vmem:[#allocation13 + $0x18] sm:$0xff] %v2073_v16  ;;  %v2034_v18 = vpop.f32.mrb[54].mxu1  ;;  %v2075_v20 = vpop.f32.mrb[26].mxu0 }
0x12a2   :  { %v2035_v21 = vpop.f32.mrb[55].mxu1  ;;  %v2076_v58 = vpop.f32.mrb[27].mxu0 }
0x12a3   :  { %2777 = shalt.err (!%p2774_p2)
}
0x12a4   :  { %s2778_s28 = scalar_lea.hbm %s3322_s11, 512 }
0x12a5   :  { %p2779_p3 = scmp.ne.s32.totalorder %s3322_s11, %s2778_s28  ;;  %p2782_p4 = scmp.lt.u32.totalorder %s2778_s28, %s3322_s11 }
0x12a7   :  { %p2784_p5 = pnand %p2782_p4, %p2779_p3 }
0x12a9   :  { %2787 = shalt.err (!%p2784_p5)
}
0x12aa   :  { %2091 = dma.vmem_to_hbm [thread:$0]  %s2089_s12, 512, %s3322_s11, [#allocation6]  }
0x12ab   :  { %2796 = dma.done.wait [#allocation6], 512  }
0x12ac   :  { %2797 = vsyncadd [#allocation6], 4294966784 }
0x12ad   :  { %2095 = vsyncpa [#allocation5], 1 }
0x12ae   :  { %2096 = vsyncpa [#allocation8], 1 }
0x12af   :  { %2097 = vsyncpa [#allocation11], 1 }
0x12b0   :  { %2098 = vsyncpa [#allocation6], 1 }
0x12b1   :  { %2099 = vsyncmov [#allocation3] }
0x12b4   :  { %s2100_s16 = vpop.sfrf %2099 }
0x12b5   :  { %p2234_p6 = scmp.ne.s32.totalorder %s2100_s16, 0 }
0x12b7   :  { %2104 = shalt.err (%p2234_p6)  }

</bundles_post_ra>
